<compile_context>
chip_gen: v7x
topology: tpu7x:2x2x1
jax: 0.10.0
libtpu: 0.0.40
codegen_flags: <defaults>
</compile_context>

<pallas_src>
import functools

import numpy as np
import jax
import jax.numpy as jnp
from jax import lax
from jax.experimental import pallas as pl
from jax.experimental.pallas import tpu as pltpu


def _round_up(x, m):
    return (x + m - 1) // m * m


def _conv_out(n, k, s):
    return (n - k) // s + 1


# --------------------- host-side conv1 im2col indices --------------------- #

def _conv1_im2col_indices(b, c, h, w, o2h, o2w, tap_rows):
    """Gather map for the conv1 im2col slab A1.

    Row r = j*tap_rows + (oy2*o2w + ox2)*b + n, where j = ky2*4 + kx2 is the
    conv2 tap this conv1 output position feeds (rows are duplicated across
    overlapping conv2 windows so every downstream slice is contiguous).
    Rows >= o2h*o2w*b within each tap block index the appended zero element.
    Column t = (ky1*8 + kx1)*c + ch, value = obs[n, ch, 4*oy1+ky1, 4*ox1+kx1]
    with (oy1, ox1) = (2*oy2 + ky2, 2*ox2 + kx2).
    """
    zero_idx = b * c * h * w                     # -> appended 0.0 (padding rows)
    k1 = 8 * 8 * c
    idx = np.full((16 * tap_rows, k1), zero_idx, np.int64)
    ky1 = np.arange(8).repeat(8 * c)
    kx1 = np.tile(np.arange(8).repeat(c), 8)
    ch = np.tile(np.arange(c), 64)
    m2 = o2h * o2w * b
    for j in range(16):
        ky2, kx2 = divmod(j, 4)
        for q in range(m2):
            pos, n = divmod(q, b)
            oy2, ox2 = divmod(pos, o2w)
            iy = 4 * (2 * oy2 + ky2) + ky1
            ix = 4 * (2 * ox2 + kx2) + kx1
            idx[j * tap_rows + q] = ((n * c + ch) * h + iy) * w + ix
    return jnp.asarray(idx, jnp.int32)


# ------------------------------ fused kernel ------------------------------ #

def _dqn_fused_kernel(a1_ref, w1_ref, b1_ref, w2_ref, b2_ref, w3_ref, b3_ref,
                      wf1_ref, bf1_ref, wf2_ref, bf2_ref, q_ref,
                      z2_ref, z3_ref, *, tap_rows, n_tap2, c1, n_pos3, c2,
                      batch):
    """Whole DQN forward pass; every ref is a full-array VMEM block."""
    bf16, f32 = jnp.bfloat16, jnp.float32

    # conv1: single K-filled GEMM (K = 8*8*C = 256); bias-add / ReLU in f32.
    y1 = jnp.dot(a1_ref[...], w1_ref[...], preferred_element_type=f32)
    y1 = jnp.maximum(y1 + b1_ref[...], 0.0)            # (16*tap_rows, c1) f32

    # conv2 im2col: tap j is a contiguous, 8-aligned row block of y1; pack the
    # tap blocks side-by-side on the lane axis of the (tap_rows, 16*c1) slab.
    for j in range(n_tap2):
        z2_ref[:, j * c1:(j + 1) * c1] = y1[j * tap_rows:(j + 1) * tap_rows, :]
    y2 = jnp.dot(z2_ref[...].astype(bf16), w2_ref[...],
                 preferred_element_type=f32)            # K = 16*c1 = 512
    y2 = jnp.maximum(y2 + b2_ref[...], 0.0)             # (tap_rows, c2) f32
    # rows >= 9*batch of y2 are padding garbage; they are never read below.

    # conv3 (1x1 output): its im2col slab is conv2's (oy2, ox2, n) row blocks
    # moved onto the lane axis.  z3 rows [batch, 8) stay zero (lane/sublane
    # dense fc path; garbage rows are sliced away in the wrapper).
    z3_ref[...] = jnp.zeros_like(z3_ref)
    for p in range(n_pos3):
        z3_ref[0:batch, p * c2:(p + 1) * c2] = y2[p * batch:(p + 1) * batch, :]
    y3 = jnp.dot(z3_ref[...].astype(bf16), w3_ref[...],
                 preferred_element_type=f32)            # K = 9*c2 = 576
    y3 = jnp.maximum(y3 + b3_ref[...], 0.0)             # (8, 64) f32

    # fc1 / fc2 (fc2 zero-padded to 128 columns -> lane-dense output store).
    h = jnp.dot(y3.astype(bf16), wf1_ref[...], preferred_element_type=f32)
    h = jnp.maximum(h + bf1_ref[...], 0.0)              # (8, 512) f32
    q = jnp.dot(h.astype(bf16), wf2_ref[...],
                preferred_element_type=f32) + bf2_ref[...]
    q_ref[...] = q                                      # full (8, 128) store


# ------------------------------- parameters ------------------------------- #

def init_params(key, c, h, w, num_actions):
    """Deterministic synthetic parameters in PyTorch layout (DQNNet.__init__)."""
    o1, p1 = _conv_out(h, 8, 4), _conv_out(w, 8, 4)
    o2, p2 = _conv_out(o1, 4, 2), _conv_out(p1, 4, 2)
    o3, p3 = _conv_out(o2, 3, 1), _conv_out(p2, 3, 1)
    feat_dim = 64 * o3 * p3
    shapes = {
        "conv1_w": (32, c, 8, 8),   "conv1_b": (32,),
        "conv2_w": (64, 32, 4, 4),  "conv2_b": (64,),
        "conv3_w": (64, 64, 3, 3),  "conv3_b": (64,),
        "fc1_w":   (512, feat_dim), "fc1_b":   (512,),
        "fc2_w":   (num_actions, 512), "fc2_b": (num_actions,),
    }
    params = {}
    for i, (name, shp) in enumerate(sorted(shapes.items())):
        params[name] = 0.05 * jax.random.normal(jax.random.fold_in(key, i),
                                                shp, jnp.float32)
    return params


def prepare_params(params, b, c, h, w, num_actions):
    """One-time preprocessing (hoisted out of the forward pass)."""
    o1h, o1w = _conv_out(h, 8, 4), _conv_out(w, 8, 4)
    o2h, o2w = _conv_out(o1h, 4, 2), _conv_out(o1w, 4, 2)
    o3h, o3w = _conv_out(o2h, 3, 1), _conv_out(o2w, 3, 1)
    assert o3h == 1 and o3w == 1, "choose H, W so the conv stack ends at 1x1"

    n_tap2 = 4 * 4                      # conv2 kernel taps
    n_pos3 = o2h * o2w                  # conv2 output positions == conv3 taps
    m2 = n_pos3 * b
    tap_rows = _round_up(m2, 8)         # 8-aligned rows per conv2-tap block
    a1_idx = _conv1_im2col_indices(b, c, h, w, o2h, o2w, tap_rows)

    bf16, f32 = jnp.bfloat16, jnp.float32
    # conv weights -> rows ordered (ky, kx, c_in), matching the im2col columns.
    w1m = params["conv1_w"].transpose(2, 3, 1, 0).reshape(8 * 8 * c, 32).astype(bf16)
    w2m = params["conv2_w"].transpose(2, 3, 1, 0).reshape(4 * 4 * 32, 64).astype(bf16)
    w3m = params["conv3_w"].transpose(2, 3, 1, 0).reshape(3 * 3 * 64, 64).astype(bf16)
    wf1 = params["fc1_w"].T.astype(bf16)                       # (64, 512)
    # fc2 zero-padded to 128 output lanes so the final store is lane-dense.
    wf2 = jnp.zeros((512, 128), bf16).at[:, :num_actions].set(
        params["fc2_w"].T.astype(bf16))
    b1, b2, b3, bfc1 = [params[k].reshape(1, -1).astype(f32)
                        for k in ("conv1_b", "conv2_b", "conv3_b", "fc1_b")]
    bfc2 = jnp.zeros((1, 128), f32).at[:, :num_actions].set(
        params["fc2_b"].reshape(1, -1).astype(f32))

    # NOTE: a1_idx / meta are specialized to this batch size (same coupling as
    # the reference implementation's host-side glue).
    return {
        "a1_idx": a1_idx,
        "operands": (w1m, b1, w2m, b2, w3m, b3, wf1, bfc1, wf2, bfc2),
        "meta": dict(tap_rows=tap_rows, n_tap2=n_tap2, c1=32,
                     n_pos3=n_pos3, c2=64, batch=b),
        "num_actions": num_actions,
        "m_fc": 8,                      # fc-path rows (>= batch, sublane tile)
    }


# -------------------------------- forward --------------------------------- #

def dqn_forward(prep, obs):
    """Mapping: s -> Q(s, *).  Mirrors DQNNet.forward (features_only=False)."""
    b = obs.shape[0]
    meta = prep["meta"]
    # Host-side glue is layout-only: build conv1's im2col slab (rows ordered
    # (conv2-tap, oy2, ox2, n), zero-padded per tap block) with one gather.
    obs_flat = jnp.concatenate(
        [obs.astype(jnp.float32).reshape(-1), jnp.zeros((1,), jnp.float32)])
    a1 = obs_flat[prep["a1_idx"]].astype(jnp.bfloat16)

    kernel = functools.partial(_dqn_fused_kernel, **meta)
    q_full = pl.pallas_call(
        kernel,
        out_shape=jax.ShapeDtypeStruct((prep["m_fc"], 128), jnp.float32),
        scratch_shapes=[
            pltpu.VMEM((meta["tap_rows"], meta["n_tap2"] * meta["c1"]),
                       jnp.float32),                       # conv2 im2col slab
            pltpu.VMEM((prep["m_fc"], meta["n_pos3"] * meta["c2"]),
                       jnp.float32),                       # conv3 im2col slab
        ],
    )(a1, *prep["operands"])
    return q_full[:b, :prep["num_actions"]], None          # (Q-values, state)


def dqn_reference(params, obs):
    """Pure-JAX f32 reference (same math as the PyTorch module)."""
    dn = ("NCHW", "OIHW", "NCHW")
    x = obs.astype(jnp.float32)
    x = jax.nn.relu(lax.conv_general_dilated(x, params["conv1_w"], (4, 4),
                                             "VALID", dimension_numbers=dn)
                    + params["conv1_b"][None, :, None, None])
    x = jax.nn.relu(lax.conv_general_dilated(x, params["conv2_w"], (2, 2),
                                             "VALID", dimension_numbers=dn)
                    + params["conv2_b"][None, :, None, None])
    x = jax.nn.relu(lax.conv_general_dilated(x, params["conv3_w"], (1, 1),
                                             "VALID", dimension_numbers=dn)
                    + params["conv3_b"][None, :, None, None])
    x = x.reshape(x.shape[0], -1)
    x = jax.nn.relu(x @ params["fc1_w"].T + params["fc1_b"])
    return x @ params["fc2_w"].T + params["fc2_b"]


# ---------------------------------- main ----------------------------------- #

if __name__ == "__main__":
    key = jax.random.PRNGKey(0)
    B, C, H, W = 2, 4, 36, 36       # smallest size where the conv stack ends 1x1
    NUM_ACTIONS = 6

    params = init_params(key, C, H, W, NUM_ACTIONS)
    prep = prepare_params(params, B, C, H, W, NUM_ACTIONS)
    obs = jax.random.normal(jax.random.fold_in(key, 1234), (B, C, H, W),
                            jnp.float32)

    forward = jax.jit(functools.partial(dqn_forward, prep))
    q, state = forward(obs)
    q = jax.block_until_ready(q)

    assert q.shape == (B, NUM_ACTIONS) and q.dtype == jnp.float32
    assert state is None
    # bf16-on-MXU / f32-accumulate kernel vs. the f32 XLA reference.
    err = float(jnp.max(jnp.abs(q - dqn_reference(params, obs))))
    assert err < 1e-1, f"kernel deviates from f32 reference: max|dq|={err}"
    print("KERNEL_OK")
</pallas_src>

<mosaic_0001>
module attributes {stable_mosaic.version = 11 : i64} {
  func.func @_dqn_fused_kernel(%arg0: memref<384x256xbf16, #tpu.memory_space<vmem>>, %arg1: memref<256x32xbf16, #tpu.memory_space<vmem>>, %arg2: memref<1x32xf32, #tpu.memory_space<vmem>>, %arg3: memref<512x64xbf16, #tpu.memory_space<vmem>>, %arg4: memref<1x64xf32, #tpu.memory_space<vmem>>, %arg5: memref<576x64xbf16, #tpu.memory_space<vmem>>, %arg6: memref<1x64xf32, #tpu.memory_space<vmem>>, %arg7: memref<64x512xbf16, #tpu.memory_space<vmem>>, %arg8: memref<1x512xf32, #tpu.memory_space<vmem>>, %arg9: memref<512x128xbf16, #tpu.memory_space<vmem>>, %arg10: memref<1x128xf32, #tpu.memory_space<vmem>>, %arg11: memref<8x128xf32, #tpu.memory_space<vmem>>, %arg12: memref<24x512xf32, #tpu.memory_space<vmem>>, %arg13: memref<8x576xf32, #tpu.memory_space<vmem>>) attributes {dimension_semantics = [], scalar_prefetch = 0 : i64, scratch_operands = 2 : i64, tpu.core_type = #tpu.core_type<tc>} {
    %c0 = arith.constant 0 : index
    %c0_0 = arith.constant 0 : index
    %0 = vector.load %arg0[%c0, %c0_0] : memref<384x256xbf16, #tpu.memory_space<vmem>>, vector<384x256xbf16>
    %c0_1 = arith.constant 0 : index
    %c0_2 = arith.constant 0 : index
    %1 = vector.load %arg1[%c0_1, %c0_2] : memref<256x32xbf16, #tpu.memory_space<vmem>>, vector<256x32xbf16>
    %cst = arith.constant dense<0.000000e+00> : vector<384x32xf32>
    %2 = tpu.matmul %0, %1, %cst {dimension_numbers = #tpu.dot_dimension_numbers<[1], [0], [0], [1], [0, 0, 1, 1], [], []>} : vector<384x256xbf16>, vector<256x32xbf16>, vector<384x32xf32> -> vector<384x32xf32>
    %c0_3 = arith.constant 0 : index
    %c0_4 = arith.constant 0 : index
    %3 = vector.load %arg2[%c0_3, %c0_4] : memref<1x32xf32, #tpu.memory_space<vmem>>, vector<1x32xf32>
    %4 = vector.broadcast %3 : vector<1x32xf32> to vector<384x32xf32>
    %5 = arith.addf %2, %4 : vector<384x32xf32>
    %cst_5 = arith.constant 0.000000e+00 : f32
    %6 = vector.broadcast %cst_5 : f32 to vector<384x32xf32>
    %7 = arith.maximumf %5, %6 : vector<384x32xf32>
    %8 = vector.extract_strided_slice %7 {offsets = [0, 0], sizes = [24, 32], strides = [1, 1]} : vector<384x32xf32> to vector<24x32xf32>
    %c0_6 = arith.constant 0 : index
    %c0_7 = arith.constant 0 : index
    %9 = vector.load %arg12[%c0_6, %c0_7] : memref<24x512xf32, #tpu.memory_space<vmem>>, vector<24x32xf32>
    tpu.vector_store %arg12[%c0_6, %c0_7], %8 {strides = array<i32>} : memref<24x512xf32, #tpu.memory_space<vmem>>, vector<24x32xf32>,
    %10 = vector.extract_strided_slice %7 {offsets = [24, 0], sizes = [24, 32], strides = [1, 1]} : vector<384x32xf32> to vector<24x32xf32>
    %c0_8 = arith.constant 0 : index
    %c32 = arith.constant 32 : index
    %11 = vector.load %arg12[%c0_8, %c32] : memref<24x512xf32, #tpu.memory_space<vmem>>, vector<24x32xf32>
    tpu.vector_store %arg12[%c0_8, %c32], %10 {strides = array<i32>} : memref<24x512xf32, #tpu.memory_space<vmem>>, vector<24x32xf32>,
    %12 = vector.extract_strided_slice %7 {offsets = [48, 0], sizes = [24, 32], strides = [1, 1]} : vector<384x32xf32> to vector<24x32xf32>
    %c0_9 = arith.constant 0 : index
    %c64 = arith.constant 64 : index
    %13 = vector.load %arg12[%c0_9, %c64] : memref<24x512xf32, #tpu.memory_space<vmem>>, vector<24x32xf32>
    tpu.vector_store %arg12[%c0_9, %c64], %12 {strides = array<i32>} : memref<24x512xf32, #tpu.memory_space<vmem>>, vector<24x32xf32>,
    %14 = vector.extract_strided_slice %7 {offsets = [72, 0], sizes = [24, 32], strides = [1, 1]} : vector<384x32xf32> to vector<24x32xf32>
    %c0_10 = arith.constant 0 : index
    %c96 = arith.constant 96 : index
    %15 = vector.load %arg12[%c0_10, %c96] : memref<24x512xf32, #tpu.memory_space<vmem>>, vector<24x32xf32>
    tpu.vector_store %arg12[%c0_10, %c96], %14 {strides = array<i32>} : memref<24x512xf32, #tpu.memory_space<vmem>>, vector<24x32xf32>,
    %16 = vector.extract_strided_slice %7 {offsets = [96, 0], sizes = [24, 32], strides = [1, 1]} : vector<384x32xf32> to vector<24x32xf32>
    %c0_11 = arith.constant 0 : index
    %c128 = arith.constant 128 : index
    %17 = vector.load %arg12[%c0_11, %c128] : memref<24x512xf32, #tpu.memory_space<vmem>>, vector<24x32xf32>
    tpu.vector_store %arg12[%c0_11, %c128], %16 {strides = array<i32>} : memref<24x512xf32, #tpu.memory_space<vmem>>, vector<24x32xf32>,
    %18 = vector.extract_strided_slice %7 {offsets = [120, 0], sizes = [24, 32], strides = [1, 1]} : vector<384x32xf32> to vector<24x32xf32>
    %c0_12 = arith.constant 0 : index
    %c160 = arith.constant 160 : index
    %19 = vector.load %arg12[%c0_12, %c160] : memref<24x512xf32, #tpu.memory_space<vmem>>, vector<24x32xf32>
    tpu.vector_store %arg12[%c0_12, %c160], %18 {strides = array<i32>} : memref<24x512xf32, #tpu.memory_space<vmem>>, vector<24x32xf32>,
    %20 = vector.extract_strided_slice %7 {offsets = [144, 0], sizes = [24, 32], strides = [1, 1]} : vector<384x32xf32> to vector<24x32xf32>
    %c0_13 = arith.constant 0 : index
    %c192 = arith.constant 192 : index
    %21 = vector.load %arg12[%c0_13, %c192] : memref<24x512xf32, #tpu.memory_space<vmem>>, vector<24x32xf32>
    tpu.vector_store %arg12[%c0_13, %c192], %20 {strides = array<i32>} : memref<24x512xf32, #tpu.memory_space<vmem>>, vector<24x32xf32>,
    %22 = vector.extract_strided_slice %7 {offsets = [168, 0], sizes = [24, 32], strides = [1, 1]} : vector<384x32xf32> to vector<24x32xf32>
    %c0_14 = arith.constant 0 : index
    %c224 = arith.constant 224 : index
    %23 = vector.load %arg12[%c0_14, %c224] : memref<24x512xf32, #tpu.memory_space<vmem>>, vector<24x32xf32>
    tpu.vector_store %arg12[%c0_14, %c224], %22 {strides = array<i32>} : memref<24x512xf32, #tpu.memory_space<vmem>>, vector<24x32xf32>,
    %24 = vector.extract_strided_slice %7 {offsets = [192, 0], sizes = [24, 32], strides = [1, 1]} : vector<384x32xf32> to vector<24x32xf32>
    %c0_15 = arith.constant 0 : index
    %c256 = arith.constant 256 : index
    %25 = vector.load %arg12[%c0_15, %c256] : memref<24x512xf32, #tpu.memory_space<vmem>>, vector<24x32xf32>
    tpu.vector_store %arg12[%c0_15, %c256], %24 {strides = array<i32>} : memref<24x512xf32, #tpu.memory_space<vmem>>, vector<24x32xf32>,
    %26 = vector.extract_strided_slice %7 {offsets = [216, 0], sizes = [24, 32], strides = [1, 1]} : vector<384x32xf32> to vector<24x32xf32>
    %c0_16 = arith.constant 0 : index
    %c288 = arith.constant 288 : index
    %27 = vector.load %arg12[%c0_16, %c288] : memref<24x512xf32, #tpu.memory_space<vmem>>, vector<24x32xf32>
    tpu.vector_store %arg12[%c0_16, %c288], %26 {strides = array<i32>} : memref<24x512xf32, #tpu.memory_space<vmem>>, vector<24x32xf32>,
    %28 = vector.extract_strided_slice %7 {offsets = [240, 0], sizes = [24, 32], strides = [1, 1]} : vector<384x32xf32> to vector<24x32xf32>
    %c0_17 = arith.constant 0 : index
    %c320 = arith.constant 320 : index
    %29 = vector.load %arg12[%c0_17, %c320] : memref<24x512xf32, #tpu.memory_space<vmem>>, vector<24x32xf32>
    tpu.vector_store %arg12[%c0_17, %c320], %28 {strides = array<i32>} : memref<24x512xf32, #tpu.memory_space<vmem>>, vector<24x32xf32>,
    %30 = vector.extract_strided_slice %7 {offsets = [264, 0], sizes = [24, 32], strides = [1, 1]} : vector<384x32xf32> to vector<24x32xf32>
    %c0_18 = arith.constant 0 : index
    %c352 = arith.constant 352 : index
    %31 = vector.load %arg12[%c0_18, %c352] : memref<24x512xf32, #tpu.memory_space<vmem>>, vector<24x32xf32>
    tpu.vector_store %arg12[%c0_18, %c352], %30 {strides = array<i32>} : memref<24x512xf32, #tpu.memory_space<vmem>>, vector<24x32xf32>,
    %32 = vector.extract_strided_slice %7 {offsets = [288, 0], sizes = [24, 32], strides = [1, 1]} : vector<384x32xf32> to vector<24x32xf32>
    %c0_19 = arith.constant 0 : index
    %c384 = arith.constant 384 : index
    %33 = vector.load %arg12[%c0_19, %c384] : memref<24x512xf32, #tpu.memory_space<vmem>>, vector<24x32xf32>
    tpu.vector_store %arg12[%c0_19, %c384], %32 {strides = array<i32>} : memref<24x512xf32, #tpu.memory_space<vmem>>, vector<24x32xf32>,
    %34 = vector.extract_strided_slice %7 {offsets = [312, 0], sizes = [24, 32], strides = [1, 1]} : vector<384x32xf32> to vector<24x32xf32>
    %c0_20 = arith.constant 0 : index
    %c416 = arith.constant 416 : index
    %35 = vector.load %arg12[%c0_20, %c416] : memref<24x512xf32, #tpu.memory_space<vmem>>, vector<24x32xf32>
    tpu.vector_store %arg12[%c0_20, %c416], %34 {strides = array<i32>} : memref<24x512xf32, #tpu.memory_space<vmem>>, vector<24x32xf32>,
    %36 = vector.extract_strided_slice %7 {offsets = [336, 0], sizes = [24, 32], strides = [1, 1]} : vector<384x32xf32> to vector<24x32xf32>
    %c0_21 = arith.constant 0 : index
    %c448 = arith.constant 448 : index
    %37 = vector.load %arg12[%c0_21, %c448] : memref<24x512xf32, #tpu.memory_space<vmem>>, vector<24x32xf32>
    tpu.vector_store %arg12[%c0_21, %c448], %36 {strides = array<i32>} : memref<24x512xf32, #tpu.memory_space<vmem>>, vector<24x32xf32>,
    %38 = vector.extract_strided_slice %7 {offsets = [360, 0], sizes = [24, 32], strides = [1, 1]} : vector<384x32xf32> to vector<24x32xf32>
    %c0_22 = arith.constant 0 : index
    %c480 = arith.constant 480 : index
    %39 = vector.load %arg12[%c0_22, %c480] : memref<24x512xf32, #tpu.memory_space<vmem>>, vector<24x32xf32>
    tpu.vector_store %arg12[%c0_22, %c480], %38 {strides = array<i32>} : memref<24x512xf32, #tpu.memory_space<vmem>>, vector<24x32xf32>,
    %c0_23 = arith.constant 0 : index
    %c0_24 = arith.constant 0 : index
    %40 = vector.load %arg12[%c0_23, %c0_24] : memref<24x512xf32, #tpu.memory_space<vmem>>, vector<24x512xf32>
    %41 = arith.truncf %40 : vector<24x512xf32> to vector<24x512xbf16>
    %c0_25 = arith.constant 0 : index
    %c0_26 = arith.constant 0 : index
    %42 = vector.load %arg3[%c0_25, %c0_26] : memref<512x64xbf16, #tpu.memory_space<vmem>>, vector<512x64xbf16>
    %cst_27 = arith.constant dense<0.000000e+00> : vector<24x64xf32>
    %43 = tpu.matmul %41, %42, %cst_27 {dimension_numbers = #tpu.dot_dimension_numbers<[1], [0], [0], [1], [0, 0, 1, 1], [], []>} : vector<24x512xbf16>, vector<512x64xbf16>, vector<24x64xf32> -> vector<24x64xf32>
    %c0_28 = arith.constant 0 : index
    %c0_29 = arith.constant 0 : index
    %44 = vector.load %arg4[%c0_28, %c0_29] : memref<1x64xf32, #tpu.memory_space<vmem>>, vector<1x64xf32>
    %45 = vector.broadcast %44 : vector<1x64xf32> to vector<24x64xf32>
    %46 = arith.addf %43, %45 : vector<24x64xf32>
    %cst_30 = arith.constant 0.000000e+00 : f32
    %47 = vector.broadcast %cst_30 : f32 to vector<24x64xf32>
    %48 = arith.maximumf %46, %47 : vector<24x64xf32>
    %cst_31 = arith.constant 0.000000e+00 : f32
    %49 = vector.broadcast %cst_31 : f32 to vector<8x576xf32>
    %c0_32 = arith.constant 0 : index
    %c0_33 = arith.constant 0 : index
    %50 = vector.load %arg13[%c0_32, %c0_33] : memref<8x576xf32, #tpu.memory_space<vmem>>, vector<8x576xf32>
    tpu.vector_store %arg13[%c0_32, %c0_33], %49 {strides = array<i32>} : memref<8x576xf32, #tpu.memory_space<vmem>>, vector<8x576xf32>,
    %51 = vector.extract_strided_slice %48 {offsets = [0, 0], sizes = [2, 64], strides = [1, 1]} : vector<24x64xf32> to vector<2x64xf32>
    %c0_34 = arith.constant 0 : index
    %c0_35 = arith.constant 0 : index
    %52 = vector.load %arg13[%c0_34, %c0_35] : memref<8x576xf32, #tpu.memory_space<vmem>>, vector<2x64xf32>
    tpu.vector_store %arg13[%c0_34, %c0_35], %51 {strides = array<i32>} : memref<8x576xf32, #tpu.memory_space<vmem>>, vector<2x64xf32>,
    %53 = vector.extract_strided_slice %48 {offsets = [2, 0], sizes = [2, 64], strides = [1, 1]} : vector<24x64xf32> to vector<2x64xf32>
    %c0_36 = arith.constant 0 : index
    %c64_37 = arith.constant 64 : index
    %54 = vector.load %arg13[%c0_36, %c64_37] : memref<8x576xf32, #tpu.memory_space<vmem>>, vector<2x64xf32>
    tpu.vector_store %arg13[%c0_36, %c64_37], %53 {strides = array<i32>} : memref<8x576xf32, #tpu.memory_space<vmem>>, vector<2x64xf32>,
    %55 = vector.extract_strided_slice %48 {offsets = [4, 0], sizes = [2, 64], strides = [1, 1]} : vector<24x64xf32> to vector<2x64xf32>
    %c0_38 = arith.constant 0 : index
    %c128_39 = arith.constant 128 : index
    %56 = vector.load %arg13[%c0_38, %c128_39] : memref<8x576xf32, #tpu.memory_space<vmem>>, vector<2x64xf32>
    tpu.vector_store %arg13[%c0_38, %c128_39], %55 {strides = array<i32>} : memref<8x576xf32, #tpu.memory_space<vmem>>, vector<2x64xf32>,
    %57 = vector.extract_strided_slice %48 {offsets = [6, 0], sizes = [2, 64], strides = [1, 1]} : vector<24x64xf32> to vector<2x64xf32>
    %c0_40 = arith.constant 0 : index
    %c192_41 = arith.constant 192 : index
    %58 = vector.load %arg13[%c0_40, %c192_41] : memref<8x576xf32, #tpu.memory_space<vmem>>, vector<2x64xf32>
    tpu.vector_store %arg13[%c0_40, %c192_41], %57 {strides = array<i32>} : memref<8x576xf32, #tpu.memory_space<vmem>>, vector<2x64xf32>,
    %59 = vector.extract_strided_slice %48 {offsets = [8, 0], sizes = [2, 64], strides = [1, 1]} : vector<24x64xf32> to vector<2x64xf32>
    %c0_42 = arith.constant 0 : index
    %c256_43 = arith.constant 256 : index
    %60 = vector.load %arg13[%c0_42, %c256_43] : memref<8x576xf32, #tpu.memory_space<vmem>>, vector<2x64xf32>
    tpu.vector_store %arg13[%c0_42, %c256_43], %59 {strides = array<i32>} : memref<8x576xf32, #tpu.memory_space<vmem>>, vector<2x64xf32>,
    %61 = vector.extract_strided_slice %48 {offsets = [10, 0], sizes = [2, 64], strides = [1, 1]} : vector<24x64xf32> to vector<2x64xf32>
    %c0_44 = arith.constant 0 : index
    %c320_45 = arith.constant 320 : index
    %62 = vector.load %arg13[%c0_44, %c320_45] : memref<8x576xf32, #tpu.memory_space<vmem>>, vector<2x64xf32>
    tpu.vector_store %arg13[%c0_44, %c320_45], %61 {strides = array<i32>} : memref<8x576xf32, #tpu.memory_space<vmem>>, vector<2x64xf32>,
    %63 = vector.extract_strided_slice %48 {offsets = [12, 0], sizes = [2, 64], strides = [1, 1]} : vector<24x64xf32> to vector<2x64xf32>
    %c0_46 = arith.constant 0 : index
    %c384_47 = arith.constant 384 : index
    %64 = vector.load %arg13[%c0_46, %c384_47] : memref<8x576xf32, #tpu.memory_space<vmem>>, vector<2x64xf32>
    tpu.vector_store %arg13[%c0_46, %c384_47], %63 {strides = array<i32>} : memref<8x576xf32, #tpu.memory_space<vmem>>, vector<2x64xf32>,
    %65 = vector.extract_strided_slice %48 {offsets = [14, 0], sizes = [2, 64], strides = [1, 1]} : vector<24x64xf32> to vector<2x64xf32>
    %c0_48 = arith.constant 0 : index
    %c448_49 = arith.constant 448 : index
    %66 = vector.load %arg13[%c0_48, %c448_49] : memref<8x576xf32, #tpu.memory_space<vmem>>, vector<2x64xf32>
    tpu.vector_store %arg13[%c0_48, %c448_49], %65 {strides = array<i32>} : memref<8x576xf32, #tpu.memory_space<vmem>>, vector<2x64xf32>,
    %67 = vector.extract_strided_slice %48 {offsets = [16, 0], sizes = [2, 64], strides = [1, 1]} : vector<24x64xf32> to vector<2x64xf32>
    %c0_50 = arith.constant 0 : index
    %c512 = arith.constant 512 : index
    %68 = vector.load %arg13[%c0_50, %c512] : memref<8x576xf32, #tpu.memory_space<vmem>>, vector<2x64xf32>
    tpu.vector_store %arg13[%c0_50, %c512], %67 {strides = array<i32>} : memref<8x576xf32, #tpu.memory_space<vmem>>, vector<2x64xf32>,
    %c0_51 = arith.constant 0 : index
    %c0_52 = arith.constant 0 : index
    %69 = vector.load %arg13[%c0_51, %c0_52] : memref<8x576xf32, #tpu.memory_space<vmem>>, vector<8x576xf32>
    %70 = arith.truncf %69 : vector<8x576xf32> to vector<8x576xbf16>
    %c0_53 = arith.constant 0 : index
    %c0_54 = arith.constant 0 : index
    %71 = vector.load %arg5[%c0_53, %c0_54] : memref<576x64xbf16, #tpu.memory_space<vmem>>, vector<576x64xbf16>
    %cst_55 = arith.constant dense<0.000000e+00> : vector<8x64xf32>
    %72 = tpu.matmul %70, %71, %cst_55 {dimension_numbers = #tpu.dot_dimension_numbers<[1], [0], [0], [1], [0, 0, 1, 1], [], []>} : vector<8x576xbf16>, vector<576x64xbf16>, vector<8x64xf32> -> vector<8x64xf32>
    %c0_56 = arith.constant 0 : index
    %c0_57 = arith.constant 0 : index
    %73 = vector.load %arg6[%c0_56, %c0_57] : memref<1x64xf32, #tpu.memory_space<vmem>>, vector<1x64xf32>
    %74 = vector.broadcast %73 : vector<1x64xf32> to vector<8x64xf32>
    %75 = arith.addf %72, %74 : vector<8x64xf32>
    %cst_58 = arith.constant 0.000000e+00 : f32
    %76 = vector.broadcast %cst_58 : f32 to vector<8x64xf32>
    %77 = arith.maximumf %75, %76 : vector<8x64xf32>
    %78 = arith.truncf %77 : vector<8x64xf32> to vector<8x64xbf16>
    %c0_59 = arith.constant 0 : index
    %c0_60 = arith.constant 0 : index
    %79 = vector.load %arg7[%c0_59, %c0_60] : memref<64x512xbf16, #tpu.memory_space<vmem>>, vector<64x512xbf16>
    %cst_61 = arith.constant dense<0.000000e+00> : vector<8x512xf32>
    %80 = tpu.matmul %78, %79, %cst_61 {dimension_numbers = #tpu.dot_dimension_numbers<[1], [0], [0], [1], [0, 0, 1, 1], [], []>} : vector<8x64xbf16>, vector<64x512xbf16>, vector<8x512xf32> -> vector<8x512xf32>
    %c0_62 = arith.constant 0 : index
    %c0_63 = arith.constant 0 : index
    %81 = vector.load %arg8[%c0_62, %c0_63] : memref<1x512xf32, #tpu.memory_space<vmem>>, vector<1x512xf32>
    %82 = vector.broadcast %81 : vector<1x512xf32> to vector<8x512xf32>
    %83 = arith.addf %80, %82 : vector<8x512xf32>
    %cst_64 = arith.constant 0.000000e+00 : f32
    %84 = vector.broadcast %cst_64 : f32 to vector<8x512xf32>
    %85 = arith.maximumf %83, %84 : vector<8x512xf32>
    %86 = arith.truncf %85 : vector<8x512xf32> to vector<8x512xbf16>
    %c0_65 = arith.constant 0 : index
    %c0_66 = arith.constant 0 : index
    %87 = vector.load %arg9[%c0_65, %c0_66] : memref<512x128xbf16, #tpu.memory_space<vmem>>, vector<512x128xbf16>
    %cst_67 = arith.constant dense<0.000000e+00> : vector<8x128xf32>
    %88 = tpu.matmul %86, %87, %cst_67 {dimension_numbers = #tpu.dot_dimension_numbers<[1], [0], [0], [1], [0, 0, 1, 1], [], []>} : vector<8x512xbf16>, vector<512x128xbf16>, vector<8x128xf32> -> vector<8x128xf32>
    %c0_68 = arith.constant 0 : index
    %c0_69 = arith.constant 0 : index
    %89 = vector.load %arg10[%c0_68, %c0_69] : memref<1x128xf32, #tpu.memory_space<vmem>>, vector<1x128xf32>
    %90 = vector.broadcast %89 : vector<1x128xf32> to vector<8x128xf32>
    %91 = arith.addf %88, %90 : vector<8x128xf32>
    %c0_70 = arith.constant 0 : index
    %c0_71 = arith.constant 0 : index
    %92 = vector.load %arg11[%c0_70, %c0_71] : memref<8x128xf32, #tpu.memory_space<vmem>>, vector<8x128xf32>
    tpu.vector_store %arg11[%c0_70, %c0_71], %91 {strides = array<i32>} : memref<8x128xf32, #tpu.memory_space<vmem>>, vector<8x128xf32>,
    return
  }
}

</mosaic_0001>

<bundles_post_ra>
// kernel: dqn_forward.1
= control target key start
LH: loop header
LB: loop body
LE: loop exit
PB: predicated region body
PF: predicated region fallthrough
CT: control target
= control target key end

     0   :  { %v2907_v0 = vmov 0   ;;  %vm735_vm0 = vcmask 261120   ;;  %s2910_s28 = smov 96   ;;  %vm751_vm1 = vcmask 523520   ;;  %vm767_vm2 = vcmask 785920   ;;  %s3727_s1 = inlined_call_operand.vmem [shape: bf16[256,32], index: 1, kind: input, shape index: {}]   ;;  %s3728_s0 = inlined_call_operand.vmem [shape: bf16[384,256], index: 0, kind: input, shape index: {}]   ;;  %s3729_s2 = inlined_call_operand.vmem [shape: f32[1,32], index: 2, kind: input, shape index: {}]   ;;  %s3730_s3 = inlined_call_operand.vmem [shape: bf16[512,64], index: 3, kind: input, shape index: {}]   ;;  %s3731_s5 = inlined_call_operand.vmem [shape: bf16[576,64], index: 5, kind: input, shape index: {}]   ;;  %s3732_s4 = inlined_call_operand.vmem [shape: f32[1,64], index: 4, kind: input, shape index: {}]   ;;  %s3733_s7 = inlined_call_operand.vmem [shape: bf16[64,512], index: 7, kind: input, shape index: {}]   ;;  %s3734_s9 = inlined_call_operand.vmem [shape: bf16[512,128], index: 9, kind: input, shape index: {}]   ;;  %s3735_s6 = inlined_call_operand.vmem [shape: f32[1,64], index: 6, kind: input, shape index: {}]   ;;  %s3736_s8 = inlined_call_operand.vmem [shape: f32[1,512], index: 8, kind: input, shape index: {}]   ;;  %s3737_s10 = inlined_call_operand.vmem [shape: f32[1,128], index: 10, kind: input, shape index: {}]   ;;  %s3738_s11 = inlined_call_operand.vmem [shape: f32[8,128], index: 11, kind: output, shape index: {}]  }
   0x1   :  { %462 = vmatprep.subr.bf16.mxu0 %v2907_v0  ;;  %v2695_v1 = vld [vmem:[%s3727_s1] sm:$0xff]   ;;  %v2696_v2 = vld [vmem:[%s3727_s1 + $0x8] sm:$0xff]   ;;  %v2697_v3 = vld [vmem:[%s3727_s1 + $0x10] sm:$0xff]   ;;  %vm783_vm3 = vcmask 1048320   ;;  %vm1317_vm4 = vcmask 523264   ;;  %vm1319_vm5 = vcmask 517120  }
   0x2   :  { %463 = vmatpush1.bf16.msra.mxu0 %v2695_v1  ;;  %v2698_v4 = vld [vmem:[%s3727_s1 + $0x18] sm:$0xff]   ;;  %v2699_v5 = vld [vmem:[%s3727_s1 + $0x20] sm:$0xff]   ;;  %v2700_v7 = vld [vmem:[%s3727_s1 + $0x28] sm:$0xff]   ;;  %vm1326_vm6 = vcmask 1041920   ;;  %vm2912_vm7 = vmmov 0  }
   0x3   :  { %464 = vmatprep.subr.bf16.mxu0 %v2907_v0  ;;  %v2713_v6 = vld [vmem:[%s3728_s0 + $0x4] ss:$8 sps:$4 sm:$0xff]   ;;  %v2701_v8 = vld [vmem:[%s3727_s1 + $0x30] sm:$0xff]   ;;  %v2702_v9 = vld [vmem:[%s3727_s1 + $0x38] sm:$0xff]  }
   0x4   :  { %494 = vmatprep.mubr.bf16.mxu0 %v2713_v6  ;;  %v2703_v10 = vld [vmem:[%s3727_s1 + $0x40] sm:$0xff]   ;;  %v2704_v11 = vld [vmem:[%s3727_s1 + $0x48] sm:$0xff]   ;;  %v2705_v12 = vld [vmem:[%s3727_s1 + $0x50] sm:$0xff]  }
   0x5   :  { %v2706_v13 = vld [vmem:[%s3727_s1 + $0x58] sm:$0xff]   ;;  %v2707_v14 = vld [vmem:[%s3727_s1 + $0x60] sm:$0xff]   ;;  %v2708_v15 = vld [vmem:[%s3727_s1 + $0x68] sm:$0xff]  }
   0x6   :  { %465 = vmatpush1.bf16.msra.mxu0 %v2696_v2  ;;  %v2709_v16 = vld [vmem:[%s3727_s1 + $0x70] sm:$0xff]   ;;  %v2710_v17 = vld [vmem:[%s3727_s1 + $0x78] sm:$0xff]   ;;  %v2711_v18 = vld [vmem:[%s3728_s0] ss:$8 sps:$4 sm:$0xff]  }
   0x7   :  { %466 = vmatprep.subr.bf16.mxu0 %v2907_v0  ;;  %v2714_v19 = vld [vmem:[%s3728_s0 + $0x14] ss:$8 sps:$4 sm:$0xff]   ;;  %v2716_v20 = vld [vmem:[%s3728_s0 + $0x10] ss:$8 sps:$4 sm:$0xff]   ;;  %v2717_v21 = vld [vmem:[%s3728_s0 + $0x24] ss:$8 sps:$4 sm:$0xff]  }
   0x8   :  { %v2719_v22 = vld [vmem:[%s3728_s0 + $0x20] ss:$8 sps:$4 sm:$0xff]   ;;  %v2720_v23 = vld [vmem:[%s3728_s0 + $0x34] ss:$8 sps:$4 sm:$0xff]   ;;  %v2722_v24 = vld [vmem:[%s3728_s0 + $0x30] ss:$8 sps:$4 sm:$0xff]  }
   0x9   :  { %v2723_v25 = vld [vmem:[%s3728_s0 + $0x44] ss:$8 sps:$4 sm:$0xff]   ;;  %v2725_v26 = vld [vmem:[%s3728_s0 + $0x40] ss:$8 sps:$4 sm:$0xff]   ;;  %v2726_v27 = vld [vmem:[%s3728_s0 + $0x54] ss:$8 sps:$4 sm:$0xff]  }
   0xa   :  { %467 = vmatpush1.bf16.msra.mxu0 %v2697_v3  ;;  %v2728_v28 = vld [vmem:[%s3728_s0 + $0x50] ss:$8 sps:$4 sm:$0xff]   ;;  %v2729_v29 = vld [vmem:[%s3728_s0 + $0x64] ss:$8 sps:$4 sm:$0xff]   ;;  %v2731_v30 = vld [vmem:[%s3728_s0 + $0x60] ss:$8 sps:$4 sm:$0xff]  }
   0xb   :  { %468 = vmatprep.subr.bf16.mxu0 %v2907_v0  ;;  %v2732_v31 = vld [vmem:[%s3728_s0 + $0x74] ss:$8 sps:$4 sm:$0xff]   ;;  %v2734_v32 = vld [vmem:[%s3728_s0 + $0x70] ss:$8 sps:$4 sm:$0xff]   ;;  %v2735_v33 = vld [vmem:[%s3728_s0 + $0x84] ss:$8 sps:$4 sm:$0xff]  }
   0xc   :  { %v2737_v34 = vld [vmem:[%s3728_s0 + $0x80] ss:$8 sps:$4 sm:$0xff]   ;;  %v2738_v35 = vld [vmem:[%s3728_s0 + $0x94] ss:$8 sps:$4 sm:$0xff]   ;;  %v2740_v36 = vld [vmem:[%s3728_s0 + $0x90] ss:$8 sps:$4 sm:$0xff]  }
   0xd   :  { %v2741_v37 = vld [vmem:[%s3728_s0 + $0xa4] ss:$8 sps:$4 sm:$0xff]   ;;  %v2743_v38 = vld [vmem:[%s3728_s0 + $0xa0] ss:$8 sps:$4 sm:$0xff]   ;;  %v2744_v39 = vld [vmem:[%s3728_s0 + $0xb4] ss:$8 sps:$4 sm:$0xff]  }
   0xe   :  { %469 = vmatpush1.bf16.msra.mxu0 %v2698_v4  ;;  %v2746_v40 = vld [vmem:[%s3728_s0 + $0xb0] ss:$8 sps:$4 sm:$0xff]   ;;  %v2747_v41 = vld [vmem:[%s3728_s0 + $0xc4] ss:$8 sps:$4 sm:$0xff]   ;;  %v2749_v42 = vld [vmem:[%s3728_s0 + $0xc0] ss:$8 sps:$4 sm:$0xff]  }
   0xf   :  { %470 = vmatprep.subr.bf16.mxu0 %v2907_v0  ;;  %v2750_v43 = vld [vmem:[%s3728_s0 + $0xd4] ss:$8 sps:$4 sm:$0xff]   ;;  %v2752_v44 = vld [vmem:[%s3728_s0 + $0xd0] ss:$8 sps:$4 sm:$0xff]   ;;  %v2753_v45 = vld [vmem:[%s3728_s0 + $0xe4] ss:$8 sps:$4 sm:$0xff]  }
  0x10   :  { %v2755_v46 = vld [vmem:[%s3728_s0 + $0xe0] ss:$8 sps:$4 sm:$0xff]   ;;  %v2756_v47 = vld [vmem:[%s3728_s0 + $0xf4] ss:$8 sps:$4 sm:$0xff]   ;;  %v2758_v48 = vld [vmem:[%s3728_s0 + $0xf0] ss:$8 sps:$4 sm:$0xff]  }
  0x11   :  { %v2759_v49 = vld [vmem:[%s3728_s0 + $0x104] ss:$8 sps:$4 sm:$0xff]   ;;  %v2761_v50 = vld [vmem:[%s3728_s0 + $0x100] ss:$8 sps:$4 sm:$0xff]   ;;  %v2762_v51 = vld [vmem:[%s3728_s0 + $0x114] ss:$8 sps:$4 sm:$0xff]  }
  0x12   :  { %471 = vmatpush1.bf16.msra.mxu0 %v2699_v5  ;;  %v2764_v52 = vld [vmem:[%s3728_s0 + $0x110] ss:$8 sps:$4 sm:$0xff]   ;;  %v2765_v53 = vld [vmem:[%s3728_s0 + $0x124] ss:$8 sps:$4 sm:$0xff]   ;;  %v2767_v54 = vld [vmem:[%s3728_s0 + $0x120] ss:$8 sps:$4 sm:$0xff]  }
  0x13   :  { %472 = vmatprep.subr.bf16.mxu0 %v2907_v0  ;;  %v2768_v55 = vld [vmem:[%s3728_s0 + $0x134] ss:$8 sps:$4 sm:$0xff]   ;;  %v2770_v56 = vld [vmem:[%s3728_s0 + $0x130] ss:$8 sps:$4 sm:$0xff]   ;;  %v2771_v57 = vld [vmem:[%s3728_s0 + $0x144] ss:$8 sps:$4 sm:$0xff]  }
  0x14   :  { %v2773_v58 = vld [vmem:[%s3728_s0 + $0x140] ss:$8 sps:$4 sm:$0xff]   ;;  %v2774_v59 = vld [vmem:[%s3728_s0 + $0x154] ss:$8 sps:$4 sm:$0xff]   ;;  %v2776_v60 = vld [vmem:[%s3728_s0 + $0x150] ss:$8 sps:$4 sm:$0xff]  }
  0x15   :  { %v2777_v61 = vld [vmem:[%s3728_s0 + $0x164] ss:$8 sps:$4 sm:$0xff]   ;;  %v2779_v62 = vld [vmem:[%s3728_s0 + $0x160] ss:$8 sps:$4 sm:$0xff]   ;;  %v2780_v63 = vld [vmem:[%s3728_s0 + $0x174] ss:$8 sps:$4 sm:$0xff]  }
  0x16   :  { %473 = vmatpush1.bf16.msra.mxu0 %v2700_v7  ;;  %v2782_v1 = vld [vmem:[%s3728_s0 + $0x170] ss:$8 sps:$4 sm:$0xff]   ;;  %v3184_v2 = vld [vmem:[%s3729_s2] ss:$0 sm:$0xff]  ;;  %s2908_s0 = smov 32   ;;  %s2909_s2 = smov 64  }
  0x17   :  { %474 = vmatprep.subr.bf16.mxu0 %v2907_v0 }
  0x1a   :  { %475 = vmatpush1.bf16.msra.mxu0 %v2701_v8 }
  0x1b   :  { %476 = vmatprep.subr.bf16.mxu0 %v2907_v0 }
  0x1e   :  { %477 = vmatpush1.bf16.msra.mxu0 %v2702_v9 }
  0x1f   :  { %478 = vmatprep.subr.bf16.mxu0 %v2907_v0 }
  0x22   :  { %479 = vmatpush1.bf16.msra.mxu0 %v2703_v10 }
  0x23   :  { %480 = vmatprep.subr.bf16.mxu0 %v2907_v0 }
  0x26   :  { %481 = vmatpush1.bf16.msra.mxu0 %v2704_v11 }
  0x27   :  { %482 = vmatprep.subr.bf16.mxu0 %v2907_v0 }
  0x2a   :  { %483 = vmatpush1.bf16.msra.mxu0 %v2705_v12 }
  0x2b   :  { %484 = vmatprep.subr.bf16.mxu0 %v2907_v0 }
  0x2e   :  { %485 = vmatpush1.bf16.msra.mxu0 %v2706_v13 }
  0x2f   :  { %486 = vmatprep.subr.bf16.mxu0 %v2907_v0 }
  0x32   :  { %487 = vmatpush1.bf16.msra.mxu0 %v2707_v14 }
  0x33   :  { %488 = vmatprep.subr.bf16.mxu0 %v2907_v0 }
  0x36   :  { %489 = vmatpush1.bf16.msra.mxu0 %v2708_v15 }
  0x37   :  { %490 = vmatprep.subr.bf16.mxu0 %v2907_v0 }
  0x3a   :  { %491 = vmatpush1.bf16.msra.mxu0 %v2709_v16 }
  0x3b   :  { %492 = vmatprep.subr.bf16.mxu0 %v2907_v0 }
  0x3e   :  { %493 = vmatpush1.bf16.msra.mxu0 %v2710_v17 }
  0x41   :  { %495 = vmatmul.mubr.bf16.vlgmr.msra.gmra.mrb[0].mxu0 %v2711_v18 }
  0x42   :  { %502 = vmatprep.mubr.bf16.mxu0 %v2714_v19 }
  0x49   :  { %503 = vmatmul.mubr.bf16.gmra.mrb[4].mxu0 %v2716_v20 }
  0x4a   :  { %510 = vmatprep.mubr.bf16.mxu0 %v2717_v21 }
  0x51   :  { %511 = vmatmul.mubr.bf16.gmra.mrb[8].mxu0 %v2719_v22 }
  0x52   :  { %518 = vmatprep.mubr.bf16.mxu0 %v2720_v23 }
  0x59   :  { %519 = vmatmul.mubr.bf16.gmra.mrb[12].mxu0 %v2722_v24 }
  0x5a   :  { %526 = vmatprep.mubr.bf16.mxu0 %v2723_v25 }
  0x61   :  { %527 = vmatmul.mubr.bf16.gmra.mrb[16].mxu0 %v2725_v26 }
  0x62   :  { %534 = vmatprep.mubr.bf16.mxu0 %v2726_v27 }
  0x69   :  { %535 = vmatmul.mubr.bf16.gmra.mrb[20].mxu0 %v2728_v28 }
  0x6a   :  { %542 = vmatprep.mubr.bf16.mxu0 %v2729_v29 }
  0x71   :  { %543 = vmatmul.mubr.bf16.gmra.mrb[24].mxu0 %v2731_v30 }
  0x72   :  { %550 = vmatprep.mubr.bf16.mxu0 %v2732_v31 }
  0x79   :  { %551 = vmatmul.mubr.bf16.gmra.mrb[28].mxu0 %v2734_v32 }
  0x7a   :  { %558 = vmatprep.mubr.bf16.mxu0 %v2735_v33 }
  0x81   :  { %559 = vmatmul.mubr.bf16.gmra.mrb[32].mxu0 %v2737_v34 }
  0x82   :  { %566 = vmatprep.mubr.bf16.mxu0 %v2738_v35 }
  0x89   :  { %567 = vmatmul.mubr.bf16.gmra.mrb[36].mxu0 %v2740_v36 }
  0x8a   :  { %574 = vmatprep.mubr.bf16.mxu0 %v2741_v37 }
  0x91   :  { %575 = vmatmul.mubr.bf16.gmra.mrb[40].mxu0 %v2743_v38 }
  0x92   :  { %582 = vmatprep.mubr.bf16.mxu0 %v2744_v39 }
  0x99   :  { %583 = vmatmul.mubr.bf16.gmra.mrb[44].mxu0 %v2746_v40 }
  0x9a   :  { %590 = vmatprep.mubr.bf16.mxu0 %v2747_v41 }
  0xa1   :  { %591 = vmatmul.mubr.bf16.gmra.mrb[48].mxu0 %v2749_v42 }
  0xa2   :  { %598 = vmatprep.mubr.bf16.mxu0 %v2750_v43 }
  0xa9   :  { %599 = vmatmul.mubr.bf16.gmra.mrb[52].mxu0 %v2752_v44 }
  0xaa   :  { %606 = vmatprep.mubr.bf16.mxu0 %v2753_v45 }
  0xb1   :  { %607 = vmatmul.mubr.bf16.gmra.mrb[56].mxu0 %v2755_v46 }
  0xb2   :  { %614 = vmatprep.mubr.bf16.mxu0 %v2756_v47 }
  0xb9   :  { %615 = vmatmul.mubr.bf16.gmra.mrb[60].mxu0 %v2758_v48 }
  0xba   :  { %622 = vmatprep.mubr.bf16.mxu0 %v2759_v49 }
  0xc1   :  { %623 = vmatmul.mubr.bf16.gmra.mrb[64].mxu0 %v2761_v50 }
  0xc2   :  { %630 = vmatprep.mubr.bf16.mxu0 %v2762_v51 }
  0xc9   :  { %631 = vmatmul.mubr.bf16.gmra.mrb[68].mxu0 %v2764_v52 }
  0xca   :  { %638 = vmatprep.mubr.bf16.mxu0 %v2765_v53 }
  0xd1   :  { %639 = vmatmul.mubr.bf16.gmra.mrb[72].mxu0 %v2767_v54 }
  0xd2   :  { %646 = vmatprep.mubr.bf16.mxu0 %v2768_v55 }
  0xd9   :  { %647 = vmatmul.mubr.bf16.gmra.mrb[76].mxu0 %v2770_v56 }
  0xda   :  { %654 = vmatprep.mubr.bf16.mxu0 %v2771_v57 }
  0xe1   :  { %655 = vmatmul.mubr.bf16.gmra.mrb[80].mxu0 %v2773_v58  ;;  %v2783_v58 = vld [vmem:[%s3730_s3 + $0x40] sm:$0xff]  }
  0xe2   :  { %662 = vmatprep.mubr.bf16.mxu0 %v2774_v59  ;;  %2528 = vmatprep.subr.bf16.mxu1 %v2783_v58 }
  0xe9   :  { %663 = vmatmul.mubr.bf16.gmra.mrb[84].mxu0 %v2776_v60  ;;  %v2784_v60 = vld [vmem:[%s3730_s3] sm:$0xff]  }
  0xea   :  { %670 = vmatprep.mubr.bf16.mxu0 %v2777_v61  ;;  %2529 = vmatpush3.bf16.msra.mxu1 %v2784_v60 }
  0xf1   :  { %671 = vmatmul.mubr.bf16.gmra.mrb[88].mxu0 %v2779_v62 }
  0xf2   :  { %678 = vmatprep.mubr.bf16.mxu0 %v2780_v63 }
  0xf9   :  { %679 = vmatmul.mubr.bf16.gmra.mrb[92].mxu0 %v2782_v1 }
 0x114   :  { %v496_v3 = vpop.f32.mrb[0].mxu0 }
 0x115   :  { %v497_v4 = vadd.f32 %v3184_v2, %v496_v3  ;;  %v498_v5 = vpop.f32.mrb[1].mxu0  ;;  %v2785_v3 = vld [vmem:[%s3730_s3 + $0x48] sm:$0xff]  }
 0x116   :  { %v499_v6 = vpop.f32.mrb[2].mxu0  ;;  %2530 = vmatprep.subr.bf16.mxu1 %v2785_v3 }
 0x117   :  { %v687_v7 = vmax.f32 %v497_v4, 0.0  ;;  %v500_v8 = vadd.f32 %v3184_v2, %v499_v6  ;;  %v501_v9 = vpop.f32.mrb[3].mxu0  ;;  %v2786_v4 = vld [vmem:[%s3730_s3 + $0x8] sm:$0xff]  }
 0x118   :  { %2531 = vmatpush3.bf16.msra.mxu1 %v2786_v4 }
 0x119   :  { %736 = vst.msk [vmem:[#allocation2] sm:$0xff] %vm735_vm0, %v687_v7  ;;  %v688_v10 = vmax.f32 %v500_v8, 0.0  ;;  %v2787_v8 = vld [vmem:[%s3730_s3 + $0x50] sm:$0xff]  }
 0x11a   :  { %2532 = vmatprep.subr.bf16.mxu1 %v2787_v8 }
 0x11b   :  { %737 = vst.msk [vmem:[#allocation2 + $0x20] sm:$0xff] %vm735_vm0, %v688_v10  ;;  %v2788_v10 = vld [vmem:[%s3730_s3 + $0x10] sm:$0xff]  }
 0x11c   :  { %v504_v11 = vpop.f32.mrb[4].mxu0  ;;  %2533 = vmatpush3.bf16.msra.mxu1 %v2788_v10 }
 0x11d   :  { %v505_v12 = vadd.f32 %v3184_v2, %v504_v11  ;;  %v506_v13 = vpop.f32.mrb[5].mxu0 }
 0x11e   :  { %v507_v14 = vpop.f32.mrb[6].mxu0 }
 0x11f   :  { %v689_v15 = vmax.f32 %v505_v12, 0.0  ;;  %v508_v16 = vadd.f32 %v3184_v2, %v507_v14  ;;  %v509_v17 = vpop.f32.mrb[7].mxu0  ;;  %v2789_v14 = vld [vmem:[%s3730_s3 + $0x58] sm:$0xff]  }
 0x120   :  { %2534 = vmatprep.subr.bf16.mxu1 %v2789_v14 }
 0x121   :  { %738 = vst.msk [vmem:[#allocation2 + $0x40] sm:$0xff] %vm735_vm0, %v689_v15  ;;  %v690_v18 = vmax.f32 %v508_v16, 0.0  ;;  %v2790_v16 = vld [vmem:[%s3730_s3 + $0x18] sm:$0xff]  }
 0x122   :  { %2535 = vmatpush3.bf16.msra.mxu1 %v2790_v16 }
 0x123   :  { %742 = vrot.lane.b32.xlu1 %v690_v18, %s2908_s0 }
 0x124   :  { %v512_v19 = vpop.f32.mrb[8].mxu0 }
 0x125   :  { %v513_v20 = vadd.f32 %v3184_v2, %v512_v19  ;;  %v514_v21 = vpop.f32.mrb[9].mxu0 }
 0x126   :  { %v515_v22 = vpop.f32.mrb[10].mxu0 }
 0x127   :  { %v691_v23 = vmax.f32 %v513_v20, 0.0  ;;  %v516_v24 = vadd.f32 %v3184_v2, %v515_v22  ;;  %v517_v25 = vpop.f32.mrb[11].mxu0  ;;  %v2791_v20 = vld [vmem:[%s3730_s3 + $0x60] sm:$0xff]  }
 0x128   :  { %v2792_v22 = vld [vmem:[%s3730_s3 + $0x20] sm:$0xff]   ;;  %2536 = vmatprep.subr.bf16.mxu1 %v2791_v20 }
 0x129   :  { %744 = vrot.lane.b32.xlu1 %v691_v23, %s2908_s0  ;;  %v692_v26 = vmax.f32 %v516_v24, 0.0  ;;  %2537 = vmatpush3.bf16.msra.mxu1 %v2792_v22 }
 0x12c   :  { %v520_v27 = vpop.f32.mrb[12].mxu0 }
 0x12d   :  { %v521_v28 = vadd.f32 %v3184_v2, %v520_v27  ;;  %v522_v29 = vpop.f32.mrb[13].mxu0  ;;  %746 = vrot.lane.b32.xlu1 %v692_v26, %s2908_s0  ;;  %v2793_v27 = vld [vmem:[%s3730_s3 + $0x68] sm:$0xff]  }
 0x12e   :  { %v523_v30 = vpop.f32.mrb[14].mxu0  ;;  %2538 = vmatprep.subr.bf16.mxu1 %v2793_v27 }
 0x12f   :  { %v693_v31 = vmax.f32 %v521_v28, 0.0  ;;  %v524_v32 = vadd.f32 %v3184_v2, %v523_v30  ;;  %v525_v33 = vpop.f32.mrb[15].mxu0  ;;  %v2794_v28 = vld [vmem:[%s3730_s3 + $0x28] sm:$0xff]  }
 0x130   :  { %2539 = vmatpush3.bf16.msra.mxu1 %v2794_v28  ;;  %v2796_v33 = vld [vmem:[%s3730_s3 + $0x30] sm:$0xff]  }
 0x131   :  { %v694_v34 = vmax.f32 %v524_v32, 0.0  ;;  %758 = vrot.lane.b32.xlu0 %v693_v31, %s2909_s2  ;;  %v2795_v31 = vld [vmem:[%s3730_s3 + $0x70] sm:$0xff]  }
 0x132   :  { %2540 = vmatprep.subr.bf16.mxu1 %v2795_v31 }
 0x133   :  { %760 = vrot.lane.b32.xlu1 %v694_v34, %s2909_s2 }
 0x134   :  { %v3202_v35 = vpop.f32.mrb[16].mxu0  ;;  %2541 = vmatpush3.bf16.msra.mxu1 %v2796_v33 }
 0x135   :  { %v530_v36 = vpop.f32.mrb[17].mxu0 }
 0x136   :  { %v531_v37 = vpop.f32.mrb[18].mxu0 }
 0x137   :  { %v532_v38 = vadd.f32 %v3184_v2, %v531_v37  ;;  %v533_v39 = vpop.f32.mrb[19].mxu0  ;;  %v2797_v37 = vld [vmem:[%s3730_s3 + $0x78] sm:$0xff]  }
 0x138   :  { %2542 = vmatprep.subr.bf16.mxu1 %v2797_v37 }
 0x139   :  { %v696_v40 = vmax.f32 %v532_v38, 0.0 }
 0x13b   :  { %774 = vrot.lane.b32.xlu0 %v696_v40, %s2910_s28  ;;  %v2798_v40 = vld [vmem:[%s3730_s3 + $0x38] sm:$0xff]  }
 0x13c   :  { %v536_v41 = vpop.f32.mrb[20].mxu0  ;;  %2543 = vmatpush3.bf16.msra.mxu1 %v2798_v40 }
 0x13d   :  { %v537_v42 = vadd.f32 %v3184_v2, %v536_v41  ;;  %v538_v43 = vpop.f32.mrb[21].mxu0 }
 0x13e   :  { %v3207_v44 = vpop.f32.mrb[22].mxu0 }
 0x13f   :  { %v697_v45 = vmax.f32 %v537_v42, 0.0  ;;  %v541_v46 = vpop.f32.mrb[23].mxu0 }
 0x141   :  { %776 = vrot.lane.b32.xlu1 %v697_v45, %s2910_s28 }
 0x144   :  { %v544_v47 = vpop.f32.mrb[24].mxu0 }
 0x145   :  { %v545_v48 = vadd.f32 %v3184_v2, %v544_v47  ;;  %v546_v49 = vpop.f32.mrb[25].mxu0  ;;  %v529_v47 = vadd.f32 %v3184_v2, %v3202_v35 }
 0x146   :  { %v547_v50 = vpop.f32.mrb[26].mxu0 }
 0x147   :  { %v699_v51 = vmax.f32 %v545_v48, 0.0  ;;  %v548_v52 = vadd.f32 %v3184_v2, %v547_v50  ;;  %v549_v53 = vpop.f32.mrb[27].mxu0 }
 0x148   :  { %v540_v53 = vadd.f32 %v3184_v2, %v3207_v44 }
 0x149   :  { %787 = vst.msk [vmem:[#allocation2 + $0x8] sm:$0xff] %vm735_vm0, %v699_v51  ;;  %v700_v54 = vmax.f32 %v548_v52, 0.0  ;;  %v695_v52 = vmax.f32 %v529_v47, 0.0 }
 0x14b   :  { %788 = vst.msk [vmem:[#allocation2 + $0x28] sm:$0xff] %vm735_vm0, %v700_v54 }
 0x14c   :  { %v552_v55 = vpop.f32.mrb[28].mxu0 }
 0x14d   :  { %v553_v56 = vadd.f32 %v3184_v2, %v552_v55  ;;  %v554_v57 = vpop.f32.mrb[29].mxu0 }
 0x14e   :  { %v555_v59 = vpop.f32.mrb[30].mxu0  ;;  %v698_v57 = vmax.f32 %v540_v53, 0.0 }
 0x14f   :  { %v701_v61 = vmax.f32 %v553_v56, 0.0  ;;  %v556_v62 = vadd.f32 %v3184_v2, %v555_v59  ;;  %v557_v63 = vpop.f32.mrb[31].mxu0 }
 0x151   :  { %789 = vst.msk [vmem:[#allocation2 + $0x48] sm:$0xff] %vm735_vm0, %v701_v61  ;;  %v702_v1 = vmax.f32 %v556_v62, 0.0 }
 0x153   :  { %793 = vrot.lane.b32.xlu0 %v702_v1, %s2908_s0 }
 0x154   :  { %v560_v5 = vpop.f32.mrb[32].mxu0 }
 0x155   :  { %v561_v6 = vadd.f32 %v3184_v2, %v560_v5  ;;  %v562_v7 = vpop.f32.mrb[33].mxu0 }
 0x156   :  { %v563_v9 = vpop.f32.mrb[34].mxu0 }
 0x157   :  { %v703_v11 = vmax.f32 %v561_v6, 0.0  ;;  %v564_v12 = vadd.f32 %v3184_v2, %v563_v9  ;;  %v565_v13 = vpop.f32.mrb[35].mxu0 }
 0x159   :  { %795 = vrot.lane.b32.xlu0 %v703_v11, %s2908_s0  ;;  %v704_v15 = vmax.f32 %v564_v12, 0.0 }
 0x15c   :  { %v568_v17 = vpop.f32.mrb[36].mxu0 }
 0x15d   :  { %v569_v18 = vadd.f32 %v3184_v2, %v568_v17  ;;  %v570_v19 = vpop.f32.mrb[37].mxu0  ;;  %797 = vrot.lane.b32.xlu0 %v704_v15, %s2908_s0 }
 0x15e   :  { %v571_v21 = vpop.f32.mrb[38].mxu0 }
 0x15f   :  { %v705_v23 = vmax.f32 %v569_v18, 0.0  ;;  %v572_v24 = vadd.f32 %v3184_v2, %v571_v21  ;;  %v573_v25 = vpop.f32.mrb[39].mxu0 }
 0x161   :  { %v706_v26 = vmax.f32 %v572_v24, 0.0  ;;  %808 = vrot.lane.b32.xlu0 %v705_v23, %s2909_s2 }
 0x163   :  { %810 = vrot.lane.b32.xlu1 %v706_v26, %s2909_s2 }
 0x164   :  { %v576_v29 = vpop.f32.mrb[40].mxu0 }
 0x165   :  { %v578_v30 = vpop.f32.mrb[41].mxu0  ;;  %v577_v38 = vadd.f32 %v3184_v2, %v576_v29 }
 0x166   :  { %v579_v32 = vpop.f32.mrb[42].mxu0 }
 0x167   :  { %v580_v34 = vadd.f32 %v3184_v2, %v579_v32  ;;  %v581_v36 = vpop.f32.mrb[43].mxu0  ;;  %v707_v42 = vmax.f32 %v577_v38, 0.0 }
 0x169   :  { %v708_v39 = vmax.f32 %v580_v34, 0.0 }
 0x16b   :  { %823 = vrot.lane.b32.xlu0 %v708_v39, %s2910_s28 }
 0x16c   :  { %v584_v41 = vpop.f32.mrb[44].mxu0 }
 0x16d   :  { %v585_v43 = vadd.f32 %v3184_v2, %v584_v41  ;;  %v586_v45 = vpop.f32.mrb[45].mxu0 }
 0x16e   :  { %v587_v46 = vpop.f32.mrb[46].mxu0  ;;  %v2799_v45 = vld [vmem:[%s3730_s3 + $0xc0] sm:$0xff]  }
 0x16f   :  { %v709_v48 = vmax.f32 %v585_v43, 0.0  ;;  %v588_v49 = vadd.f32 %v3184_v2, %v587_v46  ;;  %v589_v50 = vpop.f32.mrb[47].mxu0  ;;  %812 = vrot.lane.b32.xlu0 %v707_v42, %s2909_s2  ;;  %2556 = vmatprep.subr.bf16.mxu1 %v2799_v45 }
 0x171   :  { %v710_v51 = vmax.f32 %v588_v49, 0.0  ;;  %825 = vrot.lane.b32.xlu1 %v709_v48, %s2910_s28 }
 0x173   :  { %827 = vrot.lane.b32.xlu0 %v710_v51, %s2910_s28 }
 0x174   :  { %v592_v54 = vpop.f32.mrb[48].mxu0 }
 0x175   :  { %v593_v55 = vadd.f32 %v3184_v2, %v592_v54  ;;  %v594_v56 = vpop.f32.mrb[49].mxu0  ;;  %762 = vrot.lane.b32.xlu1 %v695_v52, %s2909_s2 }
 0x176   :  { %v595_v35 = vpop.f32.mrb[50].mxu0 }
 0x177   :  { %v711_v58 = vmax.f32 %v593_v55, 0.0  ;;  %v596_v59 = vadd.f32 %v3184_v2, %v595_v35  ;;  %v597_v60 = vpop.f32.mrb[51].mxu0 }
 0x179   :  { %835 = vst.msk [vmem:[#allocation2 + $0x10] sm:$0xff] %vm735_vm0, %v711_v58  ;;  %v712_v61 = vmax.f32 %v596_v59, 0.0  ;;  %778 = vrot.lane.b32.xlu1 %v698_v57, %s2910_s28 }
 0x17b   :  { %836 = vst.msk [vmem:[#allocation2 + $0x30] sm:$0xff] %vm735_vm0, %v712_v61 }
 0x17c   :  { %v600_v44 = vpop.f32.mrb[52].mxu0 }
 0x17d   :  { %v601_v62 = vadd.f32 %v3184_v2, %v600_v44  ;;  %v602_v63 = vpop.f32.mrb[53].mxu0 }
 0x17e   :  { %v603_v1 = vpop.f32.mrb[54].mxu0 }
 0x17f   :  { %v713_v3 = vmax.f32 %v601_v62, 0.0  ;;  %v604_v4 = vadd.f32 %v3184_v2, %v603_v1  ;;  %v605_v5 = vpop.f32.mrb[55].mxu0 }
 0x181   :  { %837 = vst.msk [vmem:[#allocation2 + $0x50] sm:$0xff] %vm735_vm0, %v713_v3  ;;  %v714_v6 = vmax.f32 %v604_v4, 0.0 }
 0x183   :  { %841 = vrot.lane.b32.xlu0 %v714_v6, %s2908_s0 }
 0x184   :  { %v608_v7 = vpop.f32.mrb[56].mxu0 }
 0x185   :  { %v609_v8 = vadd.f32 %v3184_v2, %v608_v7  ;;  %v610_v9 = vpop.f32.mrb[57].mxu0 }
 0x186   :  { %v3297_v10 = vpop.f32.mrb[58].mxu0 }
 0x187   :  { %v715_v11 = vmax.f32 %v609_v8, 0.0  ;;  %v613_v12 = vpop.f32.mrb[59].mxu0 }
 0x189   :  { %843 = vrot.lane.b32.xlu1 %v715_v11, %s2908_s0 }
 0x18c   :  { %v616_v13 = vpop.f32.mrb[60].mxu0 }
 0x18d   :  { %v617_v14 = vadd.f32 %v3184_v2, %v616_v13  ;;  %v618_v15 = vpop.f32.mrb[61].mxu0 }
 0x18e   :  { %v619_v16 = vpop.f32.mrb[62].mxu0 }
 0x18f   :  { %v717_v17 = vmax.f32 %v617_v14, 0.0  ;;  %v620_v18 = vadd.f32 %v3184_v2, %v619_v16  ;;  %v621_v19 = vpop.f32.mrb[63].mxu0 }
 0x191   :  { %v718_v20 = vmax.f32 %v620_v18, 0.0  ;;  %856 = vrot.lane.b32.xlu0 %v717_v17, %s2909_s2 }
 0x193   :  { %858 = vrot.lane.b32.xlu1 %v718_v20, %s2909_s2 }
 0x194   :  { %v3304_v21 = vpop.f32.mrb[64].mxu0 }
 0x195   :  { %v626_v22 = vpop.f32.mrb[65].mxu0  ;;  %v743_v23 = vpop.permute.xlu1 %742 }
 0x196   :  { %752 = vst.msk [vmem:[#allocation2] sm:$0xff] %vm751_vm1, %v743_v23  ;;  %v3307_v24 = vpop.f32.mrb[66].mxu0 }
 0x197   :  { %v629_v25 = vpop.f32.mrb[67].mxu0  ;;  %v628_v12 = vadd.f32 %v3184_v2, %v3307_v24 }
 0x199   :  { %v720_v16 = vmax.f32 %v628_v12, 0.0 }
 0x19b   :  { %v745_v26 = vpop.permute.xlu1 %744 }
 0x19c   :  { %753 = vst.msk [vmem:[#allocation2 + $0x20] sm:$0xff] %vm751_vm1, %v745_v26  ;;  %v3310_v27 = vpop.f32.mrb[68].mxu0 }
 0x19d   :  { %v634_v28 = vpop.f32.mrb[69].mxu0  ;;  %v633_v22 = vadd.f32 %v3184_v2, %v3310_v27 }
 0x19e   :  { %v3312_v29 = vpop.f32.mrb[70].mxu0 }
 0x19f   :  { %v637_v30 = vpop.f32.mrb[71].mxu0  ;;  %v747_v31 = vpop.permute.xlu1 %746 }
 0x1a0   :  { %754 = vst.msk [vmem:[#allocation2 + $0x40] sm:$0xff] %vm751_vm1, %v747_v31  ;;  %v612_v30 = vadd.f32 %v3184_v2, %v3297_v10  ;;  %v721_v31 = vmax.f32 %v633_v22, 0.0 }
 0x1a3   :  { %v759_v32 = vpop.permute.xlu0 %758 }
 0x1a4   :  { %768 = vst.msk [vmem:[#allocation2] sm:$0xff] %vm767_vm2, %v759_v32  ;;  %v640_v33 = vpop.f32.mrb[72].mxu0 }
 0x1a5   :  { %v641_v34 = vadd.f32 %v3184_v2, %v640_v33  ;;  %v642_v36 = vpop.f32.mrb[73].mxu0  ;;  %v761_v37 = vpop.permute.xlu1 %760 }
 0x1a6   :  { %769 = vst.msk [vmem:[#allocation2 + $0x20] sm:$0xff] %vm767_vm2, %v761_v37  ;;  %v643_v38 = vpop.f32.mrb[74].mxu0  ;;  %v716_v36 = vmax.f32 %v612_v30, 0.0  ;;  %v625_v37 = vadd.f32 %v3184_v2, %v3304_v21 }
 0x1a7   :  { %v723_v39 = vmax.f32 %v641_v34, 0.0  ;;  %v644_v40 = vadd.f32 %v3184_v2, %v643_v38  ;;  %v645_v41 = vpop.f32.mrb[75].mxu0 }
 0x1a8   :  { %v719_v38 = vmax.f32 %v625_v37, 0.0 }
 0x1a9   :  { %883 = vst.msk [vmem:[#allocation2 + $0x18] sm:$0xff] %vm735_vm0, %v723_v39  ;;  %v724_v42 = vmax.f32 %v644_v40, 0.0  ;;  %v636_v39 = vadd.f32 %v3184_v2, %v3312_v29 }
 0x1ab   :  { %884 = vst.msk [vmem:[#allocation2 + $0x38] sm:$0xff] %vm735_vm0, %v724_v42  ;;  %v722_v41 = vmax.f32 %v636_v39, 0.0  ;;  %v2816_v39 = vld [vmem:[%s3731_s5] sm:$0xff]  }
 0x1ac   :  { %v648_v43 = vpop.f32.mrb[76].mxu0 }
 0x1ad   :  { %v649_v46 = vadd.f32 %v3184_v2, %v648_v43  ;;  %v650_v47 = vpop.f32.mrb[77].mxu0  ;;  %v775_v48 = vpop.permute.xlu0 %774 }
 0x1ae   :  { %784 = vst.msk [vmem:[#allocation2] sm:$0xff] %vm783_vm3, %v775_v48  ;;  %v651_v49 = vpop.f32.mrb[78].mxu0 }
 0x1af   :  { %v725_v50 = vmax.f32 %v649_v46, 0.0  ;;  %v652_v51 = vadd.f32 %v3184_v2, %v651_v49  ;;  %v653_v52 = vpop.f32.mrb[79].mxu0 }
 0x1b1   :  { %885 = vst.msk [vmem:[#allocation2 + $0x58] sm:$0xff] %vm735_vm0, %v725_v50  ;;  %v726_v53 = vmax.f32 %v652_v51, 0.0  ;;  %v2800_v50 = vld [vmem:[%s3730_s3 + $0x80] sm:$0xff]  }
 0x1b3   :  { %889 = vrot.lane.b32.xlu0 %v726_v53, %s2908_s0  ;;  %v777_v54 = vpop.permute.xlu1 %776  ;;  %v2801_v53 = vld [vmem:[%s3730_s3 + $0xc8] sm:$0xff]  }
 0x1b4   :  { %785 = vst.msk [vmem:[#allocation2 + $0x20] sm:$0xff] %vm783_vm3, %v777_v54  ;;  %v656_v55 = vpop.f32.mrb[80].mxu0 }
 0x1b5   :  { %v657_v56 = vadd.f32 %v3184_v2, %v656_v55  ;;  %v658_v35 = vpop.f32.mrb[81].mxu0  ;;  %v931_v49 = vld [vmem:[#allocation2] sm:$0xff]  ;;  %v2802_v55 = vld [vmem:[%s3730_s3 + $0x88] sm:$0xff]  }
 0x1b6   :  { %v659_v57 = vpop.f32.mrb[82].mxu0 }
 0x1b7   :  { %v727_v58 = vmax.f32 %v657_v56, 0.0  ;;  %v661_v59 = vpop.f32.mrb[83].mxu0  ;;  %v660_v17 = vadd.f32 %v3184_v2, %v659_v57  ;;  %v2803_v56 = vld [vmem:[%s3730_s3 + $0xd0] sm:$0xff]  }
 0x1b9   :  { %891 = vrot.lane.b32.xlu1 %v727_v58, %s2908_s0  ;;  %v728_v26 = vmax.f32 %v660_v17, 0.0  ;;  %v2804_v58 = vld [vmem:[%s3730_s3 + $0x90] sm:$0xff]  }
 0x1bb   :  { %v935_v29 = vld [vmem:[#allocation2 + $0x20] sm:$0xff] }
 0x1bc   :  { %v664_v60 = vpop.f32.mrb[84].mxu0  ;;  %v943_v51 = vpack.c.bf16 %v935_v29, %v931_v49 }
 0x1bd   :  { %v665_v61 = vadd.f32 %v3184_v2, %v664_v60  ;;  %v666_v44 = vpop.f32.mrb[85].mxu0  ;;  %v2805_v60 = vld [vmem:[%s3730_s3 + $0xd8] sm:$0xff]  }
 0x1be   :  { %v667_v62 = vpop.f32.mrb[86].mxu0  ;;  %v2807_v44 = vld [vmem:[%s3730_s3 + $0xe0] sm:$0xff]  }
 0x1bf   :  { %v729_v63 = vmax.f32 %v665_v61, 0.0  ;;  %v668_v1 = vadd.f32 %v3184_v2, %v667_v62  ;;  %v669_v3 = vpop.f32.mrb[87].mxu0  ;;  %v2806_v61 = vld [vmem:[%s3730_s3 + $0x98] sm:$0xff]  }
 0x1c0   :  { %v2810_v3 = vld [vmem:[%s3730_s3 + $0xa8] sm:$0xff]  }
 0x1c1   :  { %v730_v4 = vmax.f32 %v668_v1, 0.0  ;;  %904 = vrot.lane.b32.xlu0 %v729_v63, %s2909_s2  ;;  %v2808_v63 = vld [vmem:[%s3730_s3 + $0xa0] sm:$0xff]   ;;  %v2809_v1 = vld [vmem:[%s3730_s3 + $0xe8] sm:$0xff]  }
 0x1c3   :  { %906 = vrot.lane.b32.xlu1 %v730_v4, %s2909_s2  ;;  %v2811_v4 = vld [vmem:[%s3730_s3 + $0xf0] sm:$0xff]  }
 0x1c4   :  { %v672_v5 = vpop.f32.mrb[88].mxu0 }
 0x1c5   :  { %v674_v6 = vpop.f32.mrb[89].mxu0  ;;  %v794_v7 = vpop.permute.xlu0 %793  ;;  %v673_v28 = vadd.f32 %v3184_v2, %v672_v5 }
 0x1c6   :  { %802 = vst.msk [vmem:[#allocation2 + $0x8] sm:$0xff] %vm751_vm1, %v794_v7  ;;  %v675_v8 = vpop.f32.mrb[90].mxu0  ;;  %v2812_v6 = vld [vmem:[%s3730_s3 + $0xb0] sm:$0xff]  }
 0x1c7   :  { %v676_v9 = vadd.f32 %v3184_v2, %v675_v8  ;;  %v677_v11 = vpop.f32.mrb[91].mxu0  ;;  %v731_v27 = vmax.f32 %v673_v28, 0.0  ;;  %v2813_v8 = vld [vmem:[%s3730_s3 + $0xf8] sm:$0xff]  }
 0x1c9   :  { %v732_v13 = vmax.f32 %v676_v9, 0.0  ;;  %v2814_v9 = vld [vmem:[%s3730_s3 + $0xb8] sm:$0xff]  }
 0x1cb   :  { %919 = vrot.lane.b32.xlu0 %v732_v13, %s2910_s28  ;;  %v796_v14 = vpop.permute.xlu0 %795 }
 0x1cc   :  { %803 = vst.msk [vmem:[#allocation2 + $0x28] sm:$0xff] %vm751_vm1, %v796_v14  ;;  %v680_v15 = vpop.f32.mrb[92].mxu0 }
 0x1cd   :  { %v681_v18 = vadd.f32 %v3184_v2, %v680_v15  ;;  %v682_v19 = vpop.f32.mrb[93].mxu0 }
 0x1ce   :  { %v683_v20 = vpop.f32.mrb[94].mxu0 }
 0x1cf   :  { %v733_v23 = vmax.f32 %v681_v18, 0.0  ;;  %v685_v25 = vpop.f32.mrb[95].mxu0  ;;  %871 = vrot.lane.b32.xlu0 %v720_v16, %s2910_s28  ;;  %v798_v24 = vpop.permute.xlu0 %797  ;;  %v684_v33 = vadd.f32 %v3184_v2, %v683_v20 }
 0x1d0   :  { %804 = vst.msk [vmem:[#allocation2 + $0x48] sm:$0xff] %vm751_vm1, %v798_v24 }
 0x1d1   :  { %921 = vrot.lane.b32.xlu1 %v733_v23, %s2910_s28  ;;  %v734_v10 = vmax.f32 %v684_v33, 0.0 }
 0x1d3   :  { %893 = vrot.lane.b32.xlu0 %v728_v26, %s2908_s0  ;;  %v809_v32 = vpop.permute.xlu0 %808 }
 0x1d4   :  { %817 = vst.msk [vmem:[#allocation2 + $0x8] sm:$0xff] %vm767_vm2, %v809_v32 }
 0x1d5   :  { %873 = vrot.lane.b32.xlu1 %v721_v31, %s2910_s28  ;;  %v811_v34 = vpop.permute.xlu1 %810 }
 0x1d6   :  { %818 = vst.msk [vmem:[#allocation2 + $0x28] sm:$0xff] %vm767_vm2, %v811_v34 }
 0x1d7   :  { %908 = vrot.lane.b32.xlu0 %v731_v27, %s2909_s2 }
 0x1d9   :  { %845 = vrot.lane.b32.xlu1 %v716_v36, %s2908_s0 }
 0x1db   :  { %923 = vrot.lane.b32.xlu0 %v734_v10, %s2910_s28  ;;  %v2911_v10 = vmov 0.0  }
 0x1dc   :  { %1314 = vst [vmem:[#allocation3 + $0x8] sm:$0xff] %v2911_v10  ;;  %1313 = vst [vmem:[#allocation3] sm:$0xff] %v2911_v10 }
 0x1dd   :  { %v824_v40 = vpop.permute.xlu0 %823  ;;  %860 = vrot.lane.b32.xlu1 %v719_v38, %s2909_s2  ;;  %1315 = vst [vmem:[#allocation3 + $0x10] sm:$0xff] %v2911_v10  ;;  %1316 = vst [vmem:[#allocation3 + $0x18] sm:$0xff] %v2911_v10  ;;  %v2815_v38 = vld [vmem:[%s3731_s5 + $0x40] sm:$0xff]  }
 0x1de   :  { %832 = vst.msk [vmem:[#allocation2 + $0x8] sm:$0xff] %vm783_vm3, %v824_v40  ;;  %v2817_v40 = vld [vmem:[%s3731_s5 + $0x48] sm:$0xff]  }
 0x1df   :  { %1318 = vst.msk [vmem:[#allocation3 + $0x20] sm:$0xff] %vm1317_vm4, %v2911_v10 }
 0x1e1   :  { %v813_v42 = vpop.permute.xlu0 %812  ;;  %875 = vrot.lane.b32.xlu1 %v722_v41, %s2910_s28  ;;  %v2818_v41 = vld [vmem:[%s3731_s5 + $0x8] sm:$0xff]  }
 0x1e2   :  { %819 = vst.msk [vmem:[#allocation2 + $0x48] sm:$0xff] %vm767_vm2, %v813_v42  ;;  %v2819_v42 = vld [vmem:[%s3731_s5 + $0x50] sm:$0xff]  }
 0x1e3   :  { %v826_v21 = vpop.permute.xlu1 %825 }
 0x1e4   :  { %833 = vst.msk [vmem:[#allocation2 + $0x28] sm:$0xff] %vm783_vm3, %v826_v21  ;;  %v2820_v21 = vld [vmem:[%s3731_s5 + $0x10] sm:$0xff]  }
 0x1e5   :  { %v828_v43 = vpop.permute.xlu0 %827  ;;  %v932_v46 = vld [vmem:[#allocation2 + $0x8] sm:$0xff] }
 0x1e6   :  { %834 = vst.msk [vmem:[#allocation2 + $0x48] sm:$0xff] %vm783_vm3, %v828_v43  ;;  %v2821_v43 = vld [vmem:[%s3731_s5 + $0x58] sm:$0xff]  }
 0x1e7   :  { %v763_v2 = vpop.permute.xlu1 %762 }
 0x1e8   :  { %770 = vst.msk [vmem:[#allocation2 + $0x40] sm:$0xff] %vm767_vm2, %v763_v2 }
 0x1eb   :  { %v779_v45 = vpop.permute.xlu1 %778  ;;  %v936_v47 = vld [vmem:[#allocation2 + $0x28] sm:$0xff] }
 0x1ec   :  { %786 = vst.msk [vmem:[#allocation2 + $0x40] sm:$0xff] %vm783_vm3, %v779_v45  ;;  %v944_v48 = vpack.c.bf16 %v936_v47, %v932_v46  ;;  %v2822_v45 = vld [vmem:[%s3731_s5 + $0x18] sm:$0xff]  }
 0x1ed   :  { %v940_v52 = vld [vmem:[#allocation2 + $0x48] sm:$0xff] }
 0x1ee   :  { %1246 = vmatprep.mubr.bf16.mxu1 %v944_v48  ;;  %v948_v54 = vpack.c.bf16 %v940_v52, %v940_v52  ;;  %v2823_v48 = vld [vmem:[%s3731_s5 + $0x60] sm:$0xff]   ;;  %v2825_v52 = vld [vmem:[%s3731_s5 + $0x68] sm:$0xff]  }
 0x1ef   :  { %1247 = vmatmul.mubr.bf16.vlgmr.msra.gmra.mrb[0].mxu1 %v943_v51 }
 0x1f0   :  { %1254 = vmatprep.mubr.bf16.mxu1 %v948_v54  ;;  %2557 = vmatpush3.bf16.msra.mxu1 %v2800_v50  ;;  %v2824_v50 = vld [vmem:[%s3731_s5 + $0x20] sm:$0xff]  }
 0x1f1   :  { %2558 = vmatprep.subr.bf16.mxu1 %v2801_v53 }
 0x1f3   :  { %v939_v35 = vld [vmem:[#allocation2 + $0x40] sm:$0xff] }
 0x1f4   :  { %v947_v57 = vpack.c.bf16 %v939_v35, %v939_v35  ;;  %2559 = vmatpush3.bf16.msra.mxu1 %v2802_v55  ;;  %v2826_v55 = vld [vmem:[%s3731_s5 + $0x28] sm:$0xff]  }
 0x1f5   :  { %v842_v59 = vpop.permute.xlu0 %841  ;;  %2560 = vmatprep.subr.bf16.mxu1 %v2803_v56 }
 0x1f6   :  { %850 = vst.msk [vmem:[#allocation2 + $0x10] sm:$0xff] %vm751_vm1, %v842_v59  ;;  %v2828_v59 = vld [vmem:[%s3731_s5 + $0x30] sm:$0xff]  }
 0x1f7   :  { %1255 = vmatmul.mubr.bf16.gmra.mrb[4].mxu1 %v947_v57 }
 0x1f8   :  { %2561 = vmatpush3.bf16.msra.mxu1 %v2804_v58  ;;  %v2827_v58 = vld [vmem:[%s3731_s5 + $0x70] sm:$0xff]  }
 0x1f9   :  { %2562 = vmatprep.subr.bf16.mxu1 %v2805_v60  ;;  %v2406_v60 = vld [vmem:[%s3732_s4] ss:$0 sm:$0xff] }
 0x1fb   :  { %v844_v62 = vpop.permute.xlu1 %843 }
 0x1fc   :  { %851 = vst.msk [vmem:[#allocation2 + $0x30] sm:$0xff] %vm751_vm1, %v844_v62  ;;  %2563 = vmatpush3.bf16.msra.mxu1 %v2806_v61  ;;  %v2829_v62 = vld [vmem:[%s3731_s5 + $0x78] sm:$0xff]  }
 0x1fd   :  { %2564 = vmatprep.subr.bf16.mxu1 %v2807_v44 }
 0x200   :  { %2565 = vmatpush3.bf16.msra.mxu1 %v2808_v63  ;;  %v2830_v63 = vld [vmem:[%s3731_s5 + $0x38] sm:$0xff]  }
 0x201   :  { %2566 = vmatprep.subr.bf16.mxu1 %v2809_v1 }
 0x203   :  { %v857_v5 = vpop.permute.xlu0 %856 }
 0x204   :  { %865 = vst.msk [vmem:[#allocation2 + $0x10] sm:$0xff] %vm767_vm2, %v857_v5  ;;  %2567 = vmatpush3.bf16.msra.mxu1 %v2810_v3 }
 0x205   :  { %v859_v7 = vpop.permute.xlu1 %858  ;;  %2568 = vmatprep.subr.bf16.mxu1 %v2811_v4 }
 0x206   :  { %866 = vst.msk [vmem:[#allocation2 + $0x30] sm:$0xff] %vm767_vm2, %v859_v7 }
 0x208   :  { %2569 = vmatpush3.bf16.msra.mxu1 %v2812_v6 }
 0x209   :  { %2570 = vmatprep.subr.bf16.mxu1 %v2813_v8 }
 0x20c   :  { %2571 = vmatpush3.bf16.msra.mxu1 %v2814_v9  ;;  %v2831_v9 = vld [vmem:[%s3731_s5 + $0xc0] sm:$0xff]  }
 0x20d   :  { %2584 = vmatprep.subr.bf16.mxu1 %v2815_v38 }
 0x225   :  { %v890_v11 = vpop.permute.xlu0 %889 }
 0x226   :  { %898 = vst.msk [vmem:[#allocation2 + $0x18] sm:$0xff] %vm751_vm1, %v890_v11 }
 0x22b   :  { %v892_v12 = vpop.permute.xlu1 %891 }
 0x22c   :  { %899 = vst.msk [vmem:[#allocation2 + $0x38] sm:$0xff] %vm751_vm1, %v892_v12 }
 0x233   :  { %v905_v13 = vpop.permute.xlu0 %904 }
 0x234   :  { %913 = vst.msk [vmem:[#allocation2 + $0x18] sm:$0xff] %vm767_vm2, %v905_v13 }
 0x235   :  { %v907_v14 = vpop.permute.xlu1 %906 }
 0x236   :  { %914 = vst.msk [vmem:[#allocation2 + $0x38] sm:$0xff] %vm767_vm2, %v907_v14 }
 0x23d   :  { %v920_v15 = vpop.permute.xlu0 %919 }
 0x23e   :  { %928 = vst.msk [vmem:[#allocation2 + $0x18] sm:$0xff] %vm783_vm3, %v920_v15 }
 0x241   :  { %v872_v16 = vpop.permute.xlu0 %871 }
 0x242   :  { %880 = vst.msk [vmem:[#allocation2 + $0x10] sm:$0xff] %vm783_vm3, %v872_v16 }
 0x243   :  { %v922_v17 = vpop.permute.xlu1 %921 }
 0x244   :  { %929 = vst.msk [vmem:[#allocation2 + $0x38] sm:$0xff] %vm783_vm3, %v922_v17 }
 0x245   :  { %v894_v18 = vpop.permute.xlu0 %893  ;;  %v934_v23 = vld [vmem:[#allocation2 + $0x18] sm:$0xff] }
 0x246   :  { %900 = vst.msk [vmem:[#allocation2 + $0x58] sm:$0xff] %vm751_vm1, %v894_v18 }
 0x247   :  { %v874_v19 = vpop.permute.xlu1 %873 }
 0x248   :  { %881 = vst.msk [vmem:[#allocation2 + $0x30] sm:$0xff] %vm783_vm3, %v874_v19 }
 0x249   :  { %v909_v20 = vpop.permute.xlu0 %908  ;;  %v933_v30 = vld [vmem:[#allocation2 + $0x10] sm:$0xff] }
 0x24a   :  { %915 = vst.msk [vmem:[#allocation2 + $0x58] sm:$0xff] %vm767_vm2, %v909_v20 }
 0x24b   :  { %v846_v22 = vpop.permute.xlu1 %845  ;;  %v938_v25 = vld [vmem:[#allocation2 + $0x38] sm:$0xff] }
 0x24c   :  { %852 = vst.msk [vmem:[#allocation2 + $0x50] sm:$0xff] %vm751_vm1, %v846_v22  ;;  %v946_v24 = vpack.c.bf16 %v938_v25, %v934_v23 }
 0x24d   :  { %v924_v26 = vpop.permute.xlu0 %923 }
 0x24e   :  { %930 = vst.msk [vmem:[#allocation2 + $0x58] sm:$0xff] %vm783_vm3, %v924_v26  ;;  %1294 = vmatprep.mubr.bf16.mxu1 %v946_v24 }
 0x24f   :  { %v861_v28 = vpop.permute.xlu1 %860  ;;  %v937_v31 = vld [vmem:[#allocation2 + $0x30] sm:$0xff] }
 0x250   :  { %867 = vst.msk [vmem:[#allocation2 + $0x50] sm:$0xff] %vm767_vm2, %v861_v28  ;;  %v945_v32 = vpack.c.bf16 %v937_v31, %v933_v30 }
 0x252   :  { %1295 = vmatmul.mubr.bf16.vlgmr.msra.gmra.mrb[8].mxu1 %v945_v32 }
 0x253   :  { %v876_v27 = vpop.permute.xlu1 %875  ;;  %2585 = vmatpush3.bf16.msra.mxu1 %v2816_v39  ;;  %v2832_v39 = vld [vmem:[%s3731_s5 + $0x80] sm:$0xff]  }
 0x254   :  { %882 = vst.msk [vmem:[#allocation2 + $0x50] sm:$0xff] %vm783_vm3, %v876_v27  ;;  %2586 = vmatprep.subr.bf16.mxu1 %v2817_v40  ;;  %v2833_v40 = vld [vmem:[%s3731_s5 + $0xc8] sm:$0xff]  }
 0x255   :  { %v942_v33 = vld [vmem:[#allocation2 + $0x58] sm:$0xff] }
 0x256   :  { %v950_v34 = vpack.c.bf16 %v942_v33, %v942_v33 }
 0x257   :  { %2587 = vmatpush3.bf16.msra.mxu1 %v2818_v41 }
 0x258   :  { %1302 = vmatprep.mubr.bf16.mxu1 %v950_v34  ;;  %2588 = vmatprep.subr.bf16.mxu1 %v2819_v42 }
 0x25b   :  { %v941_v36 = vld [vmem:[#allocation2 + $0x50] sm:$0xff]  ;;  %2589 = vmatpush3.bf16.msra.mxu1 %v2820_v21  ;;  %v2834_v21 = vld [vmem:[%s3731_s5 + $0x88] sm:$0xff]  }
 0x25c   :  { %v949_v37 = vpack.c.bf16 %v941_v36, %v941_v36  ;;  %2590 = vmatprep.subr.bf16.mxu1 %v2821_v43  ;;  %v2835_v43 = vld [vmem:[%s3731_s5 + $0xd0] sm:$0xff]  }
 0x25e   :  { %1303 = vmatmul.mubr.bf16.gmra.mrb[12].mxu1 %v949_v37 }
 0x25f   :  { %2591 = vmatpush3.bf16.msra.mxu1 %v2822_v45  ;;  %v2838_v45 = vld [vmem:[%s3731_s5 + $0x98] sm:$0xff]  }
 0x260   :  { %2592 = vmatprep.subr.bf16.mxu1 %v2823_v48  ;;  %v2841_v48 = vld [vmem:[%s3731_s5 + $0xe8] sm:$0xff]  }
 0x263   :  { %2593 = vmatpush3.bf16.msra.mxu1 %v2824_v50  ;;  %v2843_v50 = vld [vmem:[%s3731_s5 + $0xf0] sm:$0xff]  }
 0x264   :  { %2594 = vmatprep.subr.bf16.mxu1 %v2825_v52  ;;  %v2845_v52 = vld [vmem:[%s3731_s5 + $0xf8] sm:$0xff]  }
 0x267   :  { %2595 = vmatpush3.bf16.msra.mxu1 %v2826_v55  ;;  %v2847_v55 = vld [vmem:[%s3731_s5 + $0x100] sm:$0xff]  }
 0x268   :  { %2596 = vmatprep.subr.bf16.mxu1 %v2827_v58  ;;  %v2850_v58 = vld [vmem:[%s3731_s5 + $0x118] sm:$0xff]  }
 0x26b   :  { %2597 = vmatpush3.bf16.msra.mxu1 %v2828_v59 }
 0x26c   :  { %2598 = vmatprep.subr.bf16.mxu1 %v2829_v62  ;;  %v2856_v62 = vld [vmem:[%s3733_s7 + $0x24] ss:$16 sps:$4 sm:$0xff]  }
 0x26f   :  { %2599 = vmatpush3.bf16.msra.mxu1 %v2830_v63  ;;  %v2859_v63 = vld [vmem:[%s3733_s7 + $0x44] ss:$16 sps:$4 sm:$0xff]  }
 0x270   :  { %2606 = vmatprep.subr.bf16.mxu1 %v2831_v9 }
 0x2c2   :  { %v2544_v2 = vpop.f32.mrb[0].mxu1 }
 0x2c3   :  { %v2545_v29 = vpop.f32.mrb[1].mxu1 }
 0x2c4   :  { %v2546_v46 = vadd.f32 %v2545_v29, %v2544_v2  ;;  %v2547_v47 = vpop.f32.mrb[2].mxu1  ;;  %v2836_v2 = vld [vmem:[%s3731_s5 + $0x90] sm:$0xff]   ;;  %v2837_v29 = vld [vmem:[%s3731_s5 + $0xd8] sm:$0xff]  }
 0x2c5   :  { %v2548_v49 = vpop.f32.mrb[3].mxu1 }
 0x2c6   :  { %v2549_v51 = vadd.f32 %v2548_v49, %v2547_v47  ;;  %v1249_v1 = vadd.f32 %v2546_v46, %v2406_v60  ;;  %v2839_v46 = vld [vmem:[%s3731_s5 + $0xe0] sm:$0xff]   ;;  %v2842_v49 = vld [vmem:[%s3731_s5 + $0xa8] sm:$0xff]  }
 0x2c7   :  { %v2840_v47 = vld [vmem:[%s3731_s5 + $0xa0] sm:$0xff]  }
 0x2c8   :  { %v1252_v6 = vadd.f32 %v2549_v51, %v2406_v60  ;;  %v2844_v51 = vld [vmem:[%s3731_s5 + $0xb0] sm:$0xff]  }
 0x2ca   :  { %v2550_v53 = vpop.f32.mrb[4].mxu1 }
 0x2cb   :  { %v2551_v54 = vpop.f32.mrb[5].mxu1 }
 0x2cc   :  { %v2552_v56 = vadd.f32 %v2551_v54, %v2550_v53  ;;  %v2553_v35 = vpop.f32.mrb[6].mxu1  ;;  %v2846_v53 = vld [vmem:[%s3731_s5 + $0xb8] sm:$0xff]  }
 0x2cd   :  { %v2554_v57 = vpop.f32.mrb[7].mxu1  ;;  %v2848_v35 = vld [vmem:[%s3731_s5 + $0x108] sm:$0xff]  }
 0x2ce   :  { %v1257_v23 = vadd.f32 %v2552_v56, %v2406_v60  ;;  %v2849_v57 = vld [vmem:[%s3731_s5 + $0x110] sm:$0xff]  }
 0x325   :  { %v2572_v61 = vpop.f32.mrb[8].mxu1 }
 0x326   :  { %v2573_v44 = vpop.f32.mrb[9].mxu1 }
 0x327   :  { %v2574_v3 = vadd.f32 %v2573_v44, %v2572_v61  ;;  %v2575_v4 = vpop.f32.mrb[10].mxu1  ;;  %v2851_v61 = vld [vmem:[%s3733_s7] ss:$16 sps:$4 sm:$0xff]   ;;  %v2853_v44 = vld [vmem:[%s3733_s7 + $0x4] ss:$16 sps:$4 sm:$0xff]  }
 0x328   :  { %v2576_v5 = vpop.f32.mrb[11].mxu1 }
 0x329   :  { %v1297_v7 = vadd.f32 %v2574_v3, %v1249_v1  ;;  %v2577_v8 = vadd.f32 %v2576_v5, %v2575_v4  ;;  %v2857_v1 = vld [vmem:[%s3733_s7 + $0x40] ss:$16 sps:$4 sm:$0xff]   ;;  %v2862_v3 = vld [vmem:[%s3733_s7 + $0x64] ss:$16 sps:$4 sm:$0xff]   ;;  %v2865_v5 = vld [vmem:[%s3733_s7 + $0xc] ss:$16 sps:$4 sm:$0xff]  }
 0x32a   :  { %v2860_v4 = vld [vmem:[%s3733_s7 + $0x60] ss:$16 sps:$4 sm:$0xff]  }
 0x32b   :  { %v1310_v11 = vmax.f32 %v1297_v7, 0.0  ;;  %v1300_v12 = vadd.f32 %v2577_v8, %v1252_v6 }
 0x32d   :  { %v1311_v13 = vmax.f32 %v1300_v12, 0.0  ;;  %v1331_v14 = vrot.slane %v1310_v11, 6  ;;  %v1322_v15 = vrot.slane %v1310_v11, 2  ;;  %v1328_v16 = vrot.slane %v1310_v11, 4  ;;  %1320 = vst.msk [vmem:[#allocation3] sm:$0x3] %vm1319_vm5, %v1310_v11 }
 0x32e   :  { %v2439_v12 = vld [vmem:[%s3735_s6] ss:$0 sm:$0xff] }
 0x32f   :  { %1332 = vrot.lane.b32.xlu0 %v1331_v14, %s2909_s2  ;;  %1323 = vrot.lane.b32.xlu1 %v1322_v15, %s2909_s2  ;;  %1330 = vst.msk [vmem:[#allocation3 + $0x8] sm:$0x3] %vm1319_vm5, %v1328_v16  ;;  %1336 = vst.msk [vmem:[#allocation3 + $0x10] sm:$0x3] %vm1319_vm5, %v1311_v13  ;;  %v1343_v17 = vrot.slane %v1311_v13, 4  ;;  %v1346_v19 = vrot.slane %v1311_v13, 6 }
 0x330   :  { %v1338_v20 = vrot.slane %v1311_v13, 2 }
 0x331   :  { %v2578_v18 = vpop.f32.mrb[12].mxu1  ;;  %1345 = vst.msk [vmem:[#allocation3 + $0x18] sm:$0x3] %vm1319_vm5, %v1343_v17 }
 0x332   :  { %v2579_v22 = vpop.f32.mrb[13].mxu1 }
 0x333   :  { %v2580_v25 = vadd.f32 %v2579_v22, %v2578_v18  ;;  %v2581_v24 = vpop.f32.mrb[14].mxu1  ;;  %1347 = vrot.lane.b32.xlu0 %v1346_v19, %s2909_s2  ;;  %1339 = vrot.lane.b32.xlu1 %v1338_v20, %s2909_s2 }
 0x334   :  { %v2582_v26 = vpop.f32.mrb[15].mxu1 }
 0x335   :  { %v1305_v28 = vadd.f32 %v2580_v25, %v1257_v23 }
 0x337   :  { %v1312_v30 = vmax.f32 %v1305_v28, 0.0  ;;  %v2863_v28 = vld [vmem:[%s3733_s7 + $0x8] ss:$16 sps:$4 sm:$0xff]  }
 0x339   :  { %1351 = vst.msk [vmem:[#allocation3 + $0x20] sm:$0x3] %vm1319_vm5, %v1312_v30 }
 0x340   :  { %v1356_v59 = vld [vmem:[#allocation3 + $0x20] sm:$0xff] }
 0x341   :  { %v1361_v60 = vpack.c.bf16 %v1356_v59, %v1356_v59 }
 0x3a1   :  { %v1333_v31 = vpop.permute.xlu0 %1332  ;;  %v1324_v32 = vpop.permute.xlu1 %1323 }
 0x3a2   :  { %1335 = vst.msk [vmem:[#allocation3 + $0x8] sm:$0x3] %vm1326_vm6, %v1333_v31  ;;  %1327 = vst.msk [vmem:[#allocation3] sm:$0x3] %vm1326_vm6, %v1324_v32  ;;  %v2868_v31 = vld [vmem:[%s3733_s7 + $0x2c] ss:$16 sps:$4 sm:$0xff]  }
 0x3a3   :  { %v2866_v32 = vld [vmem:[%s3733_s7 + $0x28] ss:$16 sps:$4 sm:$0xff]  }
 0x3a5   :  { %v1348_v27 = vpop.permute.xlu0 %1347  ;;  %v1340_v33 = vpop.permute.xlu1 %1339 }
 0x3a6   :  { %1350 = vst.msk [vmem:[#allocation3 + $0x18] sm:$0x3] %vm1326_vm6, %v1348_v27  ;;  %1342 = vst.msk [vmem:[#allocation3 + $0x10] sm:$0x3] %vm1326_vm6, %v1340_v33  ;;  %v2871_v27 = vld [vmem:[%s3733_s7 + $0x4c] ss:$16 sps:$4 sm:$0xff]  }
 0x3a7   :  { %v2869_v33 = vld [vmem:[%s3733_s7 + $0x48] ss:$16 sps:$4 sm:$0xff]  }
 0x3a9   :  { %v1353_v34 = vld [vmem:[#allocation3 + $0x8] sm:$0xff]  ;;  %v1352_v36 = vld [vmem:[#allocation3] sm:$0xff] }
 0x3aa   :  { %v1358_v37 = vpack.c.bf16 %v1353_v34, %v1353_v34  ;;  %v1357_v38 = vpack.c.bf16 %v1352_v36, %v1352_v36  ;;  %v2874_v34 = vld [vmem:[%s3733_s7 + $0x6c] ss:$16 sps:$4 sm:$0xff]   ;;  %v2875_v36 = vld [vmem:[%s3734_s9 + $0x40] sm:$0xff]  }
 0x3ac   :  { %1692 = vmatprep.mubr.bf16.mxu1 %v1358_v37  ;;  %v2876_v37 = vld [vmem:[%s3734_s9] sm:$0xff]  }
 0x3ad   :  { %1693 = vmatmul.mubr.bf16.vlgmr.msra.gmra.mrb[16].mxu1 %v1357_v38  ;;  %v1355_v41 = vld [vmem:[#allocation3 + $0x18] sm:$0xff]  ;;  %v1354_v54 = vld [vmem:[#allocation3 + $0x10] sm:$0xff]  ;;  %v2877_v38 = vld [vmem:[%s3734_s9 + $0x48] sm:$0xff]  }
 0x3ae   :  { %2607 = vmatpush3.bf16.msra.mxu1 %v2832_v39  ;;  %v1360_v42 = vpack.c.bf16 %v1355_v41, %v1355_v41  ;;  %v1359_v56 = vpack.c.bf16 %v1354_v54, %v1354_v54  ;;  %v2878_v39 = vld [vmem:[%s3734_s9 + $0x8] sm:$0xff]   ;;  %v2880_v41 = vld [vmem:[%s3734_s9 + $0x10] sm:$0xff]   ;;  %v1798_v54 = vld [vmem:[%s3736_s8] sm:$0xf] }
 0x3af   :  { %2608 = vmatprep.subr.bf16.mxu1 %v2833_v40  ;;  %v2879_v40 = vld [vmem:[%s3734_s9 + $0x50] sm:$0xff]  }
 0x3b0   :  { %1732 = vmatprep.mubr.bf16.mxu1 %v1360_v42  ;;  %v2881_v42 = vld [vmem:[%s3734_s9 + $0x58] sm:$0xff]  }
 0x3b2   :  { %2609 = vmatpush3.bf16.msra.mxu1 %v2834_v21  ;;  %v2882_v21 = vld [vmem:[%s3734_s9 + $0x18] sm:$0xff]  }
 0x3b3   :  { %2610 = vmatprep.subr.bf16.mxu1 %v2835_v43  ;;  %v2883_v43 = vld [vmem:[%s3734_s9 + $0x60] sm:$0xff]  }
 0x3b6   :  { %2611 = vmatpush3.bf16.msra.mxu1 %v2836_v2  ;;  %v2884_v2 = vld [vmem:[%s3734_s9 + $0x20] sm:$0xff]  }
 0x3b7   :  { %2612 = vmatprep.subr.bf16.mxu1 %v2837_v29  ;;  %v2885_v29 = vld [vmem:[%s3734_s9 + $0x68] sm:$0xff]  }
 0x3ba   :  { %2613 = vmatpush3.bf16.msra.mxu1 %v2838_v45  ;;  %v2886_v45 = vld [vmem:[%s3734_s9 + $0x28] sm:$0xff]  }
 0x3bb   :  { %2614 = vmatprep.subr.bf16.mxu1 %v2839_v46  ;;  %v2887_v46 = vld [vmem:[%s3734_s9 + $0x70] sm:$0xff]  }
 0x3be   :  { %2615 = vmatpush3.bf16.msra.mxu1 %v2840_v47  ;;  %v2888_v47 = vld [vmem:[%s3734_s9 + $0x30] sm:$0xff]  }
 0x3bf   :  { %2616 = vmatprep.subr.bf16.mxu1 %v2841_v48  ;;  %v2889_v48 = vld [vmem:[%s3734_s9 + $0x78] sm:$0xff]  }
 0x3c2   :  { %2617 = vmatpush3.bf16.msra.mxu1 %v2842_v49  ;;  %v2890_v49 = vld [vmem:[%s3734_s9 + $0x38] sm:$0xff]  }
 0x3c3   :  { %2618 = vmatprep.subr.bf16.mxu1 %v2843_v50  ;;  %v2891_v50 = vld [vmem:[%s3734_s9 + $0xc0] sm:$0xff]  }
 0x3c6   :  { %2619 = vmatpush3.bf16.msra.mxu1 %v2844_v51  ;;  %v1800_v51 = vlaneseq }
 0x3c7   :  { %2620 = vmatprep.subr.bf16.mxu1 %v2845_v52 }
 0x3c8   :  { %v1801_v52 = vshrl.u32 %v1800_v51, 7 }
 0x3ca   :  { %2621 = vmatpush3.bf16.msra.mxu1 %v2846_v53  ;;  %v1802_v53 = vsub.s32 0, %v1801_v52 }
 0x3cb   :  { %2677 = vmatprep.subr.bf16.mxu1 %v2911_v10 }
 0x3cd   :  { %1733 = vmatmul.mubr.bf16.vlgmr.msra.gmra.mrb[20].mxu1 %v1359_v56  ;;  %v1803_v56 = vrot.slane %v1798_v54, %v1802_v53 }
 0x3ce   :  { %2678 = vmatpush3.bf16.msra.mxu1 %v2847_v55  ;;  %2685 = vmatprep.mubr.msk.bf16.mxu1 %vm2912_vm7, %v2911_v10  ;;  %v1806_v55 = vsub.s32 1, %v1801_v52 }
 0x3cf   :  { %2679 = vmatprep.subr.bf16.mxu1 %v2911_v10 }
 0x3d2   :  { %2680 = vmatpush3.bf16.msra.mxu1 %v2848_v35  ;;  %v1807_v35 = vrot.slane %v1798_v54, %v1806_v55 }
 0x3d3   :  { %2681 = vmatprep.subr.bf16.mxu1 %v2911_v10 }
 0x3d6   :  { %2682 = vmatpush3.bf16.msra.mxu1 %v2849_v57 }
 0x3d7   :  { %2683 = vmatprep.subr.bf16.mxu1 %v2911_v10  ;;  %v2854_v10 = vld [vmem:[%s3733_s7 + $0x20] ss:$16 sps:$4 sm:$0xff]  }
 0x3da   :  { %2684 = vmatpush3.bf16.msra.mxu1 %v2850_v58 }
 0x3db   :  { %1903 = vmatprep.subr.bf16.mxu1 %v2853_v44 }
 0x3dd   :  { %2686 = vmatmul.mubr.msk.bf16.vlgmr.msra.gmra.mrb[24].mxu1 %vm1317_vm4, %v1361_v60 }
 0x3de   :  { %1935 = vmatprep.mubr.bf16.mxu1 %v2907_v0  ;;  %1904 = vmatpush1.bf16.msra.mxu1 %v2851_v61 }
 0x3df   :  { %1905 = vmatprep.subr.bf16.mxu1 %v2856_v62 }
 0x3e2   :  { %1906 = vmatpush1.bf16.msra.mxu1 %v2854_v10 }
 0x3e3   :  { %1907 = vmatprep.subr.bf16.mxu1 %v2859_v63 }
 0x3e6   :  { %1908 = vmatpush1.bf16.msra.mxu1 %v2857_v1  ;;  %v2892_v1 = vld [vmem:[%s3734_s9 + $0x80] sm:$0xff]  }
 0x3e7   :  { %1909 = vmatprep.subr.bf16.mxu1 %v2862_v3 }
 0x3ea   :  { %1910 = vmatpush1.bf16.msra.mxu1 %v2860_v4  ;;  %v2893_v4 = vld [vmem:[%s3734_s9 + $0xc8] sm:$0xff]  }
 0x3eb   :  { %1944 = vmatprep.subr.bf16.mxu1 %v2865_v5  ;;  %v2894_v5 = vld [vmem:[%s3734_s9 + $0x88] sm:$0xff]  }
 0x480   :  { %v2600_v6 = vpop.f32.mrb[16].mxu1 }
 0x481   :  { %v2601_v7 = vpop.f32.mrb[17].mxu1 }
 0x482   :  { %v2602_v8 = vadd.f32 %v2601_v7, %v2600_v6  ;;  %v2603_v9 = vpop.f32.mrb[18].mxu1  ;;  %v1814_v6 = vsub.s32 3, %v1801_v52  ;;  %v2895_v7 = vld [vmem:[%s3734_s9 + $0xd0] sm:$0xff]  }
 0x483   :  { %v2604_v11 = vpop.f32.mrb[19].mxu1  ;;  %v2896_v9 = vld [vmem:[%s3734_s9 + $0x90] sm:$0xff]  }
 0x484   :  { %v1695_v15 = vadd.f32 %v2602_v8, %v2439_v12  ;;  %v1815_v8 = vrot.slane %v1798_v54, %v1814_v6  ;;  %v2897_v11 = vld [vmem:[%s3734_s9 + $0xd8] sm:$0xff]  }
 0x4a0   :  { %v2622_v13 = vpop.f32.mrb[20].mxu1 }
 0x4a1   :  { %v2623_v14 = vpop.f32.mrb[21].mxu1 }
 0x4a2   :  { %v2624_v16 = vadd.f32 %v2623_v14, %v2622_v13  ;;  %v2625_v17 = vpop.f32.mrb[22].mxu1 }
 0x4a3   :  { %v2626_v18 = vpop.f32.mrb[23].mxu1 }
 0x4a4   :  { %v1735_v19 = vadd.f32 %v2624_v16, %v1695_v15  ;;  %v2898_v16 = vld [vmem:[%s3734_s9 + $0x98] sm:$0xff]   ;;  %v2899_v18 = vld [vmem:[%s3734_s9 + $0xe0] sm:$0xff]  }
 0x4b0   :  { %v1774_v20 = vpop.f32.mrb[24].mxu1 }
 0x4b1   :  { %v1775_v22 = vadd.f32 %v1774_v20, %v1735_v19  ;;  %v2687_v23 = vpop.f32.mrb[25].mxu1 }
 0x4b2   :  { %v1777_v25 = vpop.f32.mrb[26].mxu1  ;;  %v1810_v23 = vsub.s32 2, %v1801_v52 }
 0x4b3   :  { %v1780_v24 = vmax.f32 %v1775_v22, 0.0  ;;  %v2688_v26 = vpop.f32.mrb[27].mxu1  ;;  %v2900_v22 = vld [vmem:[%s3734_s9 + $0xa0] sm:$0xff]   ;;  %v2901_v25 = vld [vmem:[%s3734_s9 + $0xe8] sm:$0xff]  }
 0x4b4   :  { %v1811_v26 = vrot.slane %v1798_v54, %v1810_v23 }
 0x4b5   :  { %v1781_v30 = vpack.c.bf16 %v1780_v24, %v1780_v24  ;;  %v2902_v24 = vld [vmem:[%s3734_s9 + $0xa8] sm:$0xff]  }
 0x4b7   :  { %2493 = vmatmul.mubr.msk.bf16.vlgmr.msra.gmra.mrb[28].mxu1 %vm1317_vm4, %v1781_v30 }
 0x4b8   :  { %1945 = vmatpush1.bf16.msra.mxu1 %v2863_v28  ;;  %1976 = vmatprep.mubr.bf16.mxu1 %v2907_v0  ;;  %v2872_v0 = vld [vmem:[%s3733_s7 + $0x68] ss:$16 sps:$4 sm:$0xff]   ;;  %v2903_v28 = vld [vmem:[%s3734_s9 + $0xf0] sm:$0xff]  }
 0x4b9   :  { %1946 = vmatprep.subr.bf16.mxu1 %v2868_v31 }
 0x4bc   :  { %1947 = vmatpush1.bf16.msra.mxu1 %v2866_v32  ;;  %v2905_v32 = vld [vmem:[%s3734_s9 + $0xf8] sm:$0xff]  }
 0x4bd   :  { %1948 = vmatprep.subr.bf16.mxu1 %v2871_v27  ;;  %v2906_v27 = vld [vmem:[%s3734_s9 + $0xb8] sm:$0xff]  }
 0x4c0   :  { %1949 = vmatpush1.bf16.msra.mxu1 %v2869_v33 }
 0x4c1   :  { %1950 = vmatprep.subr.bf16.mxu1 %v2874_v34 }
 0x4c4   :  { %1951 = vmatpush1.bf16.msra.mxu1 %v2872_v0 }
 0x4c5   :  { %2633 = vmatprep.subr.bf16.mxu1 %v2875_v36 }
 0x4c7   :  { %2494 = vmatmul.mubr.msk.bf16.vlgmr.msra.gmra.mrb[32].mxu1 %vm1317_vm4, %v1781_v30  ;;  %v2904_v30 = vld [vmem:[%s3734_s9 + $0xb0] sm:$0xff]  }
 0x4c8   :  { %2634 = vmatpush3.bf16.msra.mxu1 %v2876_v37 }
 0x4c9   :  { %2635 = vmatprep.subr.bf16.mxu1 %v2877_v38 }
 0x4cc   :  { %2636 = vmatpush3.bf16.msra.mxu1 %v2878_v39 }
 0x4cd   :  { %2637 = vmatprep.subr.bf16.mxu1 %v2879_v40  ;;  %v2495_v40 = vld [vmem:[%s3737_s10] ss:$0 sm:$0xff] }
 0x4d0   :  { %2638 = vmatpush3.bf16.msra.mxu1 %v2880_v41 }
 0x4d1   :  { %2639 = vmatprep.subr.bf16.mxu1 %v2881_v42 }
 0x4d4   :  { %2640 = vmatpush3.bf16.msra.mxu1 %v2882_v21 }
 0x4d5   :  { %2641 = vmatprep.subr.bf16.mxu1 %v2883_v43 }
 0x4d8   :  { %2642 = vmatpush3.bf16.msra.mxu1 %v2884_v2 }
 0x4d9   :  { %2643 = vmatprep.subr.bf16.mxu1 %v2885_v29 }
 0x4dc   :  { %2644 = vmatpush3.bf16.msra.mxu1 %v2886_v45 }
 0x4dd   :  { %2645 = vmatprep.subr.bf16.mxu1 %v2887_v46 }
 0x4e0   :  { %2646 = vmatpush3.bf16.msra.mxu1 %v2888_v47 }
 0x4e1   :  { %2647 = vmatprep.subr.bf16.mxu1 %v2889_v48 }
 0x4e4   :  { %2648 = vmatpush3.bf16.msra.mxu1 %v2890_v49 }
 0x4e5   :  { %2655 = vmatprep.subr.bf16.mxu1 %v2891_v50 }
 0x58a   :  { %v1937_v57 = vpop.f32.mrb[28].mxu1 }
 0x58b   :  { %v1938_v58 = vadd.f32 %v1937_v57, %v1803_v56  ;;  %v1939_v59 = vpop.f32.mrb[29].mxu1 }
 0x58c   :  { %v1940_v60 = vadd.f32 %v1939_v59, %v1807_v35  ;;  %v1941_v61 = vpop.f32.mrb[30].mxu1 }
 0x58d   :  { %v1985_v44 = vmax.f32 %v1938_v58, 0.0  ;;  %v1942_v62 = vpop.f32.mrb[31].mxu1 }
 0x58e   :  { %v1986_v10 = vmax.f32 %v1940_v60, 0.0 }
 0x58f   :  { %v1989_v3 = vpack.c.bf16 %v1985_v44, %v1985_v44 }
 0x590   :  { %v1990_v63 = vpack.c.bf16 %v1986_v10, %v1986_v10 }
 0x592   :  { %2288 = vmatprep.mubr.bf16.mxu1 %v1990_v63 }
 0x593   :  { %2289 = vmatmul.mubr.bf16.vlgmr.msra.gmra.mrb[36].mxu1 %v1989_v3 }
 0x594   :  { %2656 = vmatpush3.bf16.msra.mxu1 %v2892_v1 }
 0x595   :  { %2657 = vmatprep.subr.bf16.mxu1 %v2893_v4 }
 0x598   :  { %2658 = vmatpush3.bf16.msra.mxu1 %v2894_v5 }
 0x599   :  { %2659 = vmatprep.subr.bf16.mxu1 %v2895_v7 }
 0x59a   :  { %v1978_v12 = vpop.f32.mrb[32].mxu1 }
 0x59b   :  { %v1980_v13 = vpop.f32.mrb[33].mxu1  ;;  %v1979_v31 = vadd.f32 %v1978_v12, %v1811_v26 }
 0x59c   :  { %v1981_v14 = vadd.f32 %v1980_v13, %v1815_v8  ;;  %v1982_v15 = vpop.f32.mrb[34].mxu1  ;;  %2660 = vmatpush3.bf16.msra.mxu1 %v2896_v9 }
 0x59d   :  { %v1983_v17 = vpop.f32.mrb[35].mxu1  ;;  %2661 = vmatprep.subr.bf16.mxu1 %v2897_v11  ;;  %v1987_v33 = vmax.f32 %v1979_v31, 0.0 }
 0x59e   :  { %v1988_v19 = vmax.f32 %v1981_v14, 0.0 }
 0x59f   :  { %v1991_v34 = vpack.c.bf16 %v1987_v33, %v1987_v33 }
 0x5a0   :  { %v1992_v20 = vpack.c.bf16 %v1988_v19, %v1988_v19  ;;  %2662 = vmatpush3.bf16.msra.mxu1 %v2898_v16 }
 0x5a1   :  { %2663 = vmatprep.subr.bf16.mxu1 %v2899_v18 }
 0x5a2   :  { %2328 = vmatprep.mubr.bf16.mxu1 %v1992_v20 }
 0x5a4   :  { %2664 = vmatpush3.bf16.msra.mxu1 %v2900_v22 }
 0x5a5   :  { %2665 = vmatprep.subr.bf16.mxu1 %v2901_v25 }
 0x5a8   :  { %2666 = vmatpush3.bf16.msra.mxu1 %v2902_v24 }
 0x5a9   :  { %2667 = vmatprep.subr.bf16.mxu1 %v2903_v28 }
 0x5ac   :  { %2668 = vmatpush3.bf16.msra.mxu1 %v2904_v30 }
 0x5ad   :  { %2669 = vmatprep.subr.bf16.mxu1 %v2905_v32 }
 0x5b0   :  { %2670 = vmatpush3.bf16.msra.mxu1 %v2906_v27 }
 0x5b3   :  { %2329 = vmatmul.mubr.bf16.vlgmr.msra.gmra.mrb[40].mxu1 %v1991_v34 }
 0x666   :  { %v2649_v0 = vpop.f32.mrb[36].mxu1 }
 0x667   :  { %v2650_v36 = vpop.f32.mrb[37].mxu1 }
 0x668   :  { %v2651_v37 = vadd.f32 %v2650_v36, %v2649_v0  ;;  %v2652_v38 = vpop.f32.mrb[38].mxu1 }
 0x669   :  { %v2653_v39 = vpop.f32.mrb[39].mxu1 }
 0x66a   :  { %v2291_v21 = vadd.f32 %v2651_v37, %v2495_v40 }
 0x686   :  { %v2671_v41 = vpop.f32.mrb[40].mxu1 }
 0x687   :  { %v2672_v42 = vpop.f32.mrb[41].mxu1 }
 0x688   :  { %v2673_v43 = vadd.f32 %v2672_v42, %v2671_v41  ;;  %v2674_v2 = vpop.f32.mrb[42].mxu1 }
 0x689   :  { %v2675_v29 = vpop.f32.mrb[43].mxu1 }
 0x68a   :  { %v2331_v45 = vadd.f32 %v2673_v43, %v2291_v21 }
 0x68c   :  { %2336 = vst [vmem:[%s3738_s11] sm:$0xff] %v2331_v45 }

</bundles_post_ra>
